<compile_context>
chip_gen: v7x
topology: tpu7x:2x2x1
jax: 0.10.0
libtpu: 0.0.40
codegen_flags: <defaults>
</compile_context>

<pallas_src>
import math

import jax
import jax.numpy as jnp
from jax.experimental import pallas as pl
from jax.experimental.pallas import tpu as pltpu

_BN_EPS = 1e-5
_FEAT_PAD = 256          # lane width of the feature-stack activations
_HEAD_PAD = 128          # lane width of the fused actor+critic head
_CRIT_OFF = 64           # lane offset of the critic block inside the fused head

# (out_width, has_batchnorm) per Linear layer.
_FEAT_LAYERS = [(256, True), (256, True), (128, True), (128, False), (128, False)]
_ACTOR_LAYERS = [(64, True), (32, True), (32, True), (16, True), (None, False)]   # None -> action_dim
_CRITIC_LAYERS = [(64, True), (32, True), (16, True), (1, False)]


# ----------------------------- in-kernel math ------------------------------ #
def _gelu(x):
    # exact erf-based GELU (nn.GELU() default)
    return 0.5 * x * (1.0 + jax.lax.erf(x * (1.0 / math.sqrt(2.0))))


def _masked_softmax(x, mask):
    xm = jnp.where(mask, x, jnp.float32(-1e30))
    m = jnp.max(xm, axis=-1, keepdims=True)
    e = jnp.where(mask, jnp.exp(xm - m), 0.0)
    return e / jnp.sum(e, axis=-1, keepdims=True)


def make_kernel(training, real_b, b_pad, action_dim):
    inv_n = 1.0 / float(real_b)

    def kernel(x_ref, w0_ref, fw_ref, faux_ref, hw_ref, haux_ref, out_ref):
        x = x_ref[...].astype(jnp.float32)

        if training:
            # row mask: batch-stat reductions ignore the zero padding rows
            rmask_feat = (jax.lax.broadcasted_iota(jnp.int32, (b_pad, _FEAT_PAD), 0)
                          < real_b).astype(jnp.float32)
            rmask_head = rmask_feat[:, :_HEAD_PAD]
        lane_head = jax.lax.broadcasted_iota(jnp.int32, (b_pad, _HEAD_PAD), 1)
        actor_mask = lane_head < action_dim          # real actor output lanes
        left_mask = lane_head < _CRIT_OFF            # actor half of the fused head

        def bn(h, gamma, beta, rmask):
            hm = h * rmask
            mean = jnp.sum(hm, axis=0, keepdims=True) * inv_n
            d = (h - mean) * rmask
            var = jnp.sum(d * d, axis=0, keepdims=True) * inv_n   # biased var (PyTorch train)
            return (h - mean) * jax.lax.rsqrt(var + _BN_EPS) * gamma + beta

        # ---------------- feature extraction (activations at 256 lanes) ------
        x = jnp.dot(x, w0_ref[...], preferred_element_type=jnp.float32) + faux_ref[0:1, :]
        if training:                                   # layer 0 has BatchNorm
            x = bn(x, faux_ref[8:9, :], faux_ref[16:17, :], rmask_feat)
        x = _gelu(x)
        for i in range(1, 5):
            x = (jnp.dot(x, fw_ref[i - 1], preferred_element_type=jnp.float32)
                 + faux_ref[i:i + 1, :])
            if training and _FEAT_LAYERS[i][1]:
                x = bn(x, faux_ref[8 + i:9 + i, :], faux_ref[16 + i:17 + i, :], rmask_feat)
            # Dropout(0.3): identity (see TODO at top of file)
            x = _gelu(x) if i < 4 else jnp.tanh(x)

        # ---------------- fused actor+critic head (128 lanes) ----------------
        h = x[:, :_HEAD_PAD]          # real features live in lanes [0, 128)
        for i in range(5):
            h = (jnp.dot(h, hw_ref[i], preferred_element_type=jnp.float32)
                 + haux_ref[i:i + 1, :])
            if training and i <= 3:
                hbn = bn(h, haux_ref[8 + i:9 + i, :], haux_ref[16 + i:17 + i, :], rmask_head)
                # depth 3: actor layer has BN, critic final layer does not
                h = jnp.where(left_mask, hbn, h) if i == 3 else hbn
            if i <= 2:
                h = _gelu(h)
            elif i == 3:
                h = jnp.where(left_mask, _gelu(h), jnp.tanh(h))
            # i == 4: raw actor logits in lanes [0,A); critic value (already
            # tanh'd) passed through identity weight at lane 64; no activation.

        head_out = _masked_softmax(h, actor_mask)       # Softmax inside actor head
        probs = _masked_softmax(head_out, actor_mask)   # extra F.softmax in forward()

        # single lane-dense packed output: [logits(128) | probs(128) | raw(128)]
        out_ref[...] = jnp.concatenate([head_out, probs, h], axis=-1).astype(out_ref.dtype)

    return kernel


# ------------------------------ parameter init ----------------------------- #
def init_params(key, state_dim, action_dim):
    """Per-layer params with PyTorch default init (Linear U(-1/sqrt(fan_in),...))."""
    def linear(k, din, dout):
        k1, k2 = jax.random.split(k)
        bound = 1.0 / math.sqrt(din)
        w = jax.random.uniform(k1, (din, dout), jnp.float32, -bound, bound)
        b = jax.random.uniform(k2, (dout,), jnp.float32, -bound, bound)
        return w, b

    def stack(k, din, layers):
        keys = jax.random.split(k, len(layers))
        out = []
        for kk, (dout, has_bn) in zip(keys, layers):
            w, b = linear(kk, din, dout)
            if has_bn:
                g = jnp.ones((dout,), jnp.float32)
                bt = jnp.zeros((dout,), jnp.float32)
            else:
                g = bt = None
            out.append((w, b, g, bt))
            din = dout
        return out

    kf, ka, kc = jax.random.split(key, 3)
    actor_layers = [(d if d is not None else action_dim, bn) for d, bn in _ACTOR_LAYERS]
    return {
        "feature": stack(kf, state_dim, _FEAT_LAYERS),
        "actor": stack(ka, 128, actor_layers),
        "critic": stack(kc, 128, _CRITIC_LAYERS),
    }


# --------------------------- parameter packing ----------------------------- #
def pack_params(params, state_dim, action_dim, training):
    """Pack 48 per-layer tensors into 5 lane-padded slabs (done once, not per step)."""
    assert action_dim <= _CRIT_OFF, "fused head layout requires action_dim <= 64"

    def fold(w, b, g, bt):
        # eval mode: BN with running stats (mean=0, var=1) folds into the Linear
        if (not training) and g is not None:
            s = g / jnp.sqrt(jnp.float32(1.0 + _BN_EPS))
            return w * s[None, :], b * s + bt, None, None
        return w, b, g, bt

    state_pad = max(_HEAD_PAD, -(-state_dim // 128) * 128)

    # ---- feature stack ----
    w0 = jnp.zeros((state_pad, _FEAT_PAD), jnp.float32)
    fw = jnp.zeros((4, _FEAT_PAD, _FEAT_PAD), jnp.float32)
    faux = jnp.zeros((24, _FEAT_PAD), jnp.float32).at[8:16, :].set(1.0)  # gamma default 1
    for i, layer in enumerate(params["feature"]):
        w, b, g, bt = fold(*layer)
        din, dout = w.shape
        if i == 0:
            w0 = w0.at[:din, :dout].set(w)
        else:
            fw = fw.at[i - 1, :din, :dout].set(w)
        faux = faux.at[i, :dout].set(b)
        if g is not None:
            faux = faux.at[8 + i, :dout].set(g)
            faux = faux.at[16 + i, :dout].set(bt)

    # ---- fused actor + critic head ----
    hw = jnp.zeros((5, _HEAD_PAD, _HEAD_PAD), jnp.float32)
    haux = jnp.zeros((24, _HEAD_PAD), jnp.float32).at[8:16, :].set(1.0)
    for i, layer in enumerate(params["actor"]):          # actor block: lanes [0, *)
        w, b, g, bt = fold(*layer)
        din, dout = w.shape
        hw = hw.at[i, :din, :dout].set(w)
        haux = haux.at[i, :dout].set(b)
        if g is not None:
            haux = haux.at[8 + i, :dout].set(g)
            haux = haux.at[16 + i, :dout].set(bt)
    for i, layer in enumerate(params["critic"]):         # critic block: lanes [64, *)
        w, b, g, bt = fold(*layer)
        din, dout = w.shape
        r0 = 0 if i == 0 else _CRIT_OFF                  # depth 0 reads the full features
        hw = hw.at[i, r0:r0 + din, _CRIT_OFF:_CRIT_OFF + dout].set(w)
        haux = haux.at[i, _CRIT_OFF:_CRIT_OFF + dout].set(b)
        if g is not None:
            haux = haux.at[8 + i, _CRIT_OFF:_CRIT_OFF + dout].set(g)
            haux = haux.at[16 + i, _CRIT_OFF:_CRIT_OFF + dout].set(bt)
    # critic has only 4 layers: identity pass-through of the value at depth 4
    hw = hw.at[4, _CRIT_OFF, _CRIT_OFF].set(1.0)

    return {"training": training, "state_pad": state_pad,
            "w0": w0, "fw": fw, "faux": faux, "hw": hw, "haux": haux}


# --------------------------------- wrapper --------------------------------- #
def actor_critic_forward(state, packed, action_dim):
    b, sd = state.shape
    training = b > 1   # mirrors `if state.size(0) == 1: eval() else: train()`
    assert packed["training"] == training, "params were packed for the other mode"

    b_pad = -(-b // 8) * 8     # sublane multiple
    x = jnp.zeros((b_pad, packed["state_pad"]), jnp.float32).at[:b, :sd].set(state)

    vmem = pltpu.MemorySpace.VMEM
    out = pl.pallas_call(
        make_kernel(training, b, b_pad, action_dim),
        out_shape=jax.ShapeDtypeStruct((b_pad, 3 * _HEAD_PAD), jnp.float32),
        in_specs=[pl.BlockSpec(memory_space=vmem)] * 6,
        out_specs=pl.BlockSpec(memory_space=vmem),
    )(x, packed["w0"], packed["fw"], packed["faux"], packed["hw"], packed["haux"])

    action_logits = out[:b, :action_dim]
    action_probs = out[:b, _HEAD_PAD:_HEAD_PAD + action_dim]
    value = out[:b, 2 * _HEAD_PAD + _CRIT_OFF:2 * _HEAD_PAD + _CRIT_OFF + 1]
    return value, action_probs, action_logits


if __name__ == "__main__":
    STATE_DIM = 32
    ACTION_DIM = 8
    BATCH = 2

    root = jax.random.PRNGKey(0)
    k_param, k_state = jax.random.split(root)

    raw_params = init_params(k_param, STATE_DIM, ACTION_DIM)
    packed = pack_params(raw_params, STATE_DIM, ACTION_DIM, training=(BATCH > 1))
    state = jax.random.normal(k_state, (BATCH, STATE_DIM), dtype=jnp.float32)

    value, action_probs, action_logits = actor_critic_forward(state, packed, ACTION_DIM)
    jax.block_until_ready((value, action_probs, action_logits))

    assert value.shape == (BATCH, 1)
    assert action_probs.shape == (BATCH, ACTION_DIM)
    assert action_logits.shape == (BATCH, ACTION_DIM)
    # sanity: softmaxed outputs sum to 1, tanh'd value is bounded
    assert bool(jnp.all(jnp.abs(jnp.sum(action_probs, -1) - 1.0) < 1e-3))
    assert bool(jnp.all(jnp.abs(jnp.sum(action_logits, -1) - 1.0) < 1e-3))
    assert bool(jnp.all(jnp.abs(value) <= 1.0 + 1e-5))
    print("KERNEL_OK")
</pallas_src>

<mosaic_0001>
module attributes {stable_mosaic.version = 11 : i64} {
  func.func @kernel(%arg0: memref<8x128xf32, #tpu.memory_space<vmem>>, %arg1: memref<128x256xf32, #tpu.memory_space<vmem>>, %arg2: memref<4x256x256xf32, #tpu.memory_space<vmem>>, %arg3: memref<24x256xf32, #tpu.memory_space<vmem>>, %arg4: memref<5x128x128xf32, #tpu.memory_space<vmem>>, %arg5: memref<24x128xf32, #tpu.memory_space<vmem>>, %arg6: memref<8x384xf32, #tpu.memory_space<vmem>>) attributes {dimension_semantics = [], scalar_prefetch = 0 : i64, scratch_operands = 0 : i64, tpu.core_type = #tpu.core_type<tc>} {
    %c0 = arith.constant 0 : index
    %c0_0 = arith.constant 0 : index
    %0 = vector.load %arg0[%c0, %c0_0] : memref<8x128xf32, #tpu.memory_space<vmem>>, vector<8x128xf32>
    %1 = tpu.iota {dimensions = array<i32: 0>} : vector<8x256xi32>
    %c2_i32 = arith.constant 2 : i32
    %2 = vector.broadcast %c2_i32 : i32 to vector<8x256xi32>
    %3 = arith.cmpi slt, %1, %2 : vector<8x256xi32>
    %4 = arith.extui %3 : vector<8x256xi1> to vector<8x256xi32>
    %5 = arith.sitofp %4 : vector<8x256xi32> to vector<8x256xf32>
    %6 = vector.extract_strided_slice %5 {offsets = [0, 0], sizes = [8, 128], strides = [1, 1]} : vector<8x256xf32> to vector<8x128xf32>
    %7 = tpu.iota {dimensions = array<i32: 1>} : vector<8x128xi32>
    %c8_i32 = arith.constant 8 : i32
    %8 = vector.broadcast %c8_i32 : i32 to vector<8x128xi32>
    %9 = arith.cmpi slt, %7, %8 : vector<8x128xi32>
    %c64_i32 = arith.constant 64 : i32
    %10 = vector.broadcast %c64_i32 : i32 to vector<8x128xi32>
    %11 = arith.cmpi slt, %7, %10 : vector<8x128xi32>
    %c0_1 = arith.constant 0 : index
    %c0_2 = arith.constant 0 : index
    %12 = vector.load %arg1[%c0_1, %c0_2] : memref<128x256xf32, #tpu.memory_space<vmem>>, vector<128x256xf32>
    %cst = arith.constant dense<0.000000e+00> : vector<8x256xf32>
    %13 = tpu.matmul %0, %12, %cst {dimension_numbers = #tpu.dot_dimension_numbers<[1], [0], [0], [1], [0, 0, 1, 1], [], []>} : vector<8x128xf32>, vector<128x256xf32>, vector<8x256xf32> -> vector<8x256xf32>
    %c0_3 = arith.constant 0 : index
    %c0_4 = arith.constant 0 : index
    %14 = vector.load %arg3[%c0_3, %c0_4] : memref<24x256xf32, #tpu.memory_space<vmem>>, vector<1x256xf32>
    %15 = vector.broadcast %14 : vector<1x256xf32> to vector<8x256xf32>
    %16 = arith.addf %13, %15 : vector<8x256xf32>
    %c8 = arith.constant 8 : index
    %c0_5 = arith.constant 0 : index
    %17 = vector.load %arg3[%c8, %c0_5] : memref<24x256xf32, #tpu.memory_space<vmem>>, vector<1x256xf32>
    %c16 = arith.constant 16 : index
    %c0_6 = arith.constant 0 : index
    %18 = vector.load %arg3[%c16, %c0_6] : memref<24x256xf32, #tpu.memory_space<vmem>>, vector<1x256xf32>
    %19 = arith.mulf %16, %5 : vector<8x256xf32>
    %cst_7 = arith.constant dense<0.000000e+00> : vector<256xf32>
    %20 = vector.multi_reduction <add>, %19, %cst_7 [0] : vector<8x256xf32> to vector<256xf32>
    %21 = vector.shape_cast %20 : vector<256xf32> to vector<1x256xf32>
    %cst_8 = arith.constant 5.000000e-01 : f32
    %22 = vector.broadcast %cst_8 : f32 to vector<1x256xf32>
    %23 = arith.mulf %21, %22 : vector<1x256xf32>
    %24 = vector.broadcast %23 : vector<1x256xf32> to vector<8x256xf32>
    %25 = arith.subf %16, %24 : vector<8x256xf32>
    %26 = arith.mulf %25, %5 : vector<8x256xf32>
    %27 = arith.mulf %26, %26 : vector<8x256xf32>
    %cst_9 = arith.constant dense<0.000000e+00> : vector<256xf32>
    %28 = vector.multi_reduction <add>, %27, %cst_9 [0] : vector<8x256xf32> to vector<256xf32>
    %29 = vector.shape_cast %28 : vector<256xf32> to vector<1x256xf32>
    %cst_10 = arith.constant 5.000000e-01 : f32
    %30 = vector.broadcast %cst_10 : f32 to vector<1x256xf32>
    %31 = arith.mulf %29, %30 : vector<1x256xf32>
    %32 = vector.broadcast %23 : vector<1x256xf32> to vector<8x256xf32>
    %33 = arith.subf %16, %32 : vector<8x256xf32>
    %cst_11 = arith.constant 9.99999974E-6 : f32
    %34 = vector.broadcast %cst_11 : f32 to vector<1x256xf32>
    %35 = arith.addf %31, %34 : vector<1x256xf32>
    %36 = math.rsqrt %35 : vector<1x256xf32>
    %37 = vector.broadcast %36 : vector<1x256xf32> to vector<8x256xf32>
    %38 = arith.mulf %33, %37 : vector<8x256xf32>
    %39 = vector.broadcast %17 : vector<1x256xf32> to vector<8x256xf32>
    %40 = arith.mulf %38, %39 : vector<8x256xf32>
    %41 = vector.broadcast %18 : vector<1x256xf32> to vector<8x256xf32>
    %42 = arith.addf %40, %41 : vector<8x256xf32>
    %cst_12 = arith.constant 5.000000e-01 : f32
    %43 = vector.broadcast %cst_12 : f32 to vector<8x256xf32>
    %44 = arith.mulf %43, %42 : vector<8x256xf32>
    %cst_13 = arith.constant 0.707106769 : f32
    %45 = vector.broadcast %cst_13 : f32 to vector<8x256xf32>
    %46 = arith.mulf %42, %45 : vector<8x256xf32>
    %47 = math.erf %46 : vector<8x256xf32>
    %cst_14 = arith.constant 1.000000e+00 : f32
    %48 = vector.broadcast %cst_14 : f32 to vector<8x256xf32>
    %49 = arith.addf %48, %47 : vector<8x256xf32>
    %50 = arith.mulf %44, %49 : vector<8x256xf32>
    %c0_15 = arith.constant 0 : index
    %c0_16 = arith.constant 0 : index
    %c0_17 = arith.constant 0 : index
    %51 = vector.load %arg2[%c0_15, %c0_16, %c0_17] : memref<4x256x256xf32, #tpu.memory_space<vmem>>, vector<1x256x256xf32>
    %52 = vector.shape_cast %51 : vector<1x256x256xf32> to vector<256x256xf32>
    %cst_18 = arith.constant dense<0.000000e+00> : vector<8x256xf32>
    %53 = tpu.matmul %50, %52, %cst_18 {dimension_numbers = #tpu.dot_dimension_numbers<[1], [0], [0], [1], [0, 0, 1, 1], [], []>} : vector<8x256xf32>, vector<256x256xf32>, vector<8x256xf32> -> vector<8x256xf32>
    %c1 = arith.constant 1 : index
    %c0_19 = arith.constant 0 : index
    %54 = vector.load %arg3[%c1, %c0_19] : memref<24x256xf32, #tpu.memory_space<vmem>>, vector<1x256xf32>
    %55 = vector.broadcast %54 : vector<1x256xf32> to vector<8x256xf32>
    %56 = arith.addf %53, %55 : vector<8x256xf32>
    %c9 = arith.constant 9 : index
    %c0_20 = arith.constant 0 : index
    %57 = vector.load %arg3[%c9, %c0_20] : memref<24x256xf32, #tpu.memory_space<vmem>>, vector<1x256xf32>
    %c17 = arith.constant 17 : index
    %c0_21 = arith.constant 0 : index
    %58 = vector.load %arg3[%c17, %c0_21] : memref<24x256xf32, #tpu.memory_space<vmem>>, vector<1x256xf32>
    %59 = arith.mulf %56, %5 : vector<8x256xf32>
    %cst_22 = arith.constant dense<0.000000e+00> : vector<256xf32>
    %60 = vector.multi_reduction <add>, %59, %cst_22 [0] : vector<8x256xf32> to vector<256xf32>
    %61 = vector.shape_cast %60 : vector<256xf32> to vector<1x256xf32>
    %cst_23 = arith.constant 5.000000e-01 : f32
    %62 = vector.broadcast %cst_23 : f32 to vector<1x256xf32>
    %63 = arith.mulf %61, %62 : vector<1x256xf32>
    %64 = vector.broadcast %63 : vector<1x256xf32> to vector<8x256xf32>
    %65 = arith.subf %56, %64 : vector<8x256xf32>
    %66 = arith.mulf %65, %5 : vector<8x256xf32>
    %67 = arith.mulf %66, %66 : vector<8x256xf32>
    %cst_24 = arith.constant dense<0.000000e+00> : vector<256xf32>
    %68 = vector.multi_reduction <add>, %67, %cst_24 [0] : vector<8x256xf32> to vector<256xf32>
    %69 = vector.shape_cast %68 : vector<256xf32> to vector<1x256xf32>
    %cst_25 = arith.constant 5.000000e-01 : f32
    %70 = vector.broadcast %cst_25 : f32 to vector<1x256xf32>
    %71 = arith.mulf %69, %70 : vector<1x256xf32>
    %72 = vector.broadcast %63 : vector<1x256xf32> to vector<8x256xf32>
    %73 = arith.subf %56, %72 : vector<8x256xf32>
    %cst_26 = arith.constant 9.99999974E-6 : f32
    %74 = vector.broadcast %cst_26 : f32 to vector<1x256xf32>
    %75 = arith.addf %71, %74 : vector<1x256xf32>
    %76 = math.rsqrt %75 : vector<1x256xf32>
    %77 = vector.broadcast %76 : vector<1x256xf32> to vector<8x256xf32>
    %78 = arith.mulf %73, %77 : vector<8x256xf32>
    %79 = vector.broadcast %57 : vector<1x256xf32> to vector<8x256xf32>
    %80 = arith.mulf %78, %79 : vector<8x256xf32>
    %81 = vector.broadcast %58 : vector<1x256xf32> to vector<8x256xf32>
    %82 = arith.addf %80, %81 : vector<8x256xf32>
    %cst_27 = arith.constant 5.000000e-01 : f32
    %83 = vector.broadcast %cst_27 : f32 to vector<8x256xf32>
    %84 = arith.mulf %83, %82 : vector<8x256xf32>
    %cst_28 = arith.constant 0.707106769 : f32
    %85 = vector.broadcast %cst_28 : f32 to vector<8x256xf32>
    %86 = arith.mulf %82, %85 : vector<8x256xf32>
    %87 = math.erf %86 : vector<8x256xf32>
    %cst_29 = arith.constant 1.000000e+00 : f32
    %88 = vector.broadcast %cst_29 : f32 to vector<8x256xf32>
    %89 = arith.addf %88, %87 : vector<8x256xf32>
    %90 = arith.mulf %84, %89 : vector<8x256xf32>
    %c1_30 = arith.constant 1 : index
    %c0_31 = arith.constant 0 : index
    %c0_32 = arith.constant 0 : index
    %91 = vector.load %arg2[%c1_30, %c0_31, %c0_32] : memref<4x256x256xf32, #tpu.memory_space<vmem>>, vector<1x256x256xf32>
    %92 = vector.shape_cast %91 : vector<1x256x256xf32> to vector<256x256xf32>
    %cst_33 = arith.constant dense<0.000000e+00> : vector<8x256xf32>
    %93 = tpu.matmul %90, %92, %cst_33 {dimension_numbers = #tpu.dot_dimension_numbers<[1], [0], [0], [1], [0, 0, 1, 1], [], []>} : vector<8x256xf32>, vector<256x256xf32>, vector<8x256xf32> -> vector<8x256xf32>
    %c2 = arith.constant 2 : index
    %c0_34 = arith.constant 0 : index
    %94 = vector.load %arg3[%c2, %c0_34] : memref<24x256xf32, #tpu.memory_space<vmem>>, vector<1x256xf32>
    %95 = vector.broadcast %94 : vector<1x256xf32> to vector<8x256xf32>
    %96 = arith.addf %93, %95 : vector<8x256xf32>
    %c10 = arith.constant 10 : index
    %c0_35 = arith.constant 0 : index
    %97 = vector.load %arg3[%c10, %c0_35] : memref<24x256xf32, #tpu.memory_space<vmem>>, vector<1x256xf32>
    %c18 = arith.constant 18 : index
    %c0_36 = arith.constant 0 : index
    %98 = vector.load %arg3[%c18, %c0_36] : memref<24x256xf32, #tpu.memory_space<vmem>>, vector<1x256xf32>
    %99 = arith.mulf %96, %5 : vector<8x256xf32>
    %cst_37 = arith.constant dense<0.000000e+00> : vector<256xf32>
    %100 = vector.multi_reduction <add>, %99, %cst_37 [0] : vector<8x256xf32> to vector<256xf32>
    %101 = vector.shape_cast %100 : vector<256xf32> to vector<1x256xf32>
    %cst_38 = arith.constant 5.000000e-01 : f32
    %102 = vector.broadcast %cst_38 : f32 to vector<1x256xf32>
    %103 = arith.mulf %101, %102 : vector<1x256xf32>
    %104 = vector.broadcast %103 : vector<1x256xf32> to vector<8x256xf32>
    %105 = arith.subf %96, %104 : vector<8x256xf32>
    %106 = arith.mulf %105, %5 : vector<8x256xf32>
    %107 = arith.mulf %106, %106 : vector<8x256xf32>
    %cst_39 = arith.constant dense<0.000000e+00> : vector<256xf32>
    %108 = vector.multi_reduction <add>, %107, %cst_39 [0] : vector<8x256xf32> to vector<256xf32>
    %109 = vector.shape_cast %108 : vector<256xf32> to vector<1x256xf32>
    %cst_40 = arith.constant 5.000000e-01 : f32
    %110 = vector.broadcast %cst_40 : f32 to vector<1x256xf32>
    %111 = arith.mulf %109, %110 : vector<1x256xf32>
    %112 = vector.broadcast %103 : vector<1x256xf32> to vector<8x256xf32>
    %113 = arith.subf %96, %112 : vector<8x256xf32>
    %cst_41 = arith.constant 9.99999974E-6 : f32
    %114 = vector.broadcast %cst_41 : f32 to vector<1x256xf32>
    %115 = arith.addf %111, %114 : vector<1x256xf32>
    %116 = math.rsqrt %115 : vector<1x256xf32>
    %117 = vector.broadcast %116 : vector<1x256xf32> to vector<8x256xf32>
    %118 = arith.mulf %113, %117 : vector<8x256xf32>
    %119 = vector.broadcast %97 : vector<1x256xf32> to vector<8x256xf32>
    %120 = arith.mulf %118, %119 : vector<8x256xf32>
    %121 = vector.broadcast %98 : vector<1x256xf32> to vector<8x256xf32>
    %122 = arith.addf %120, %121 : vector<8x256xf32>
    %cst_42 = arith.constant 5.000000e-01 : f32
    %123 = vector.broadcast %cst_42 : f32 to vector<8x256xf32>
    %124 = arith.mulf %123, %122 : vector<8x256xf32>
    %cst_43 = arith.constant 0.707106769 : f32
    %125 = vector.broadcast %cst_43 : f32 to vector<8x256xf32>
    %126 = arith.mulf %122, %125 : vector<8x256xf32>
    %127 = math.erf %126 : vector<8x256xf32>
    %cst_44 = arith.constant 1.000000e+00 : f32
    %128 = vector.broadcast %cst_44 : f32 to vector<8x256xf32>
    %129 = arith.addf %128, %127 : vector<8x256xf32>
    %130 = arith.mulf %124, %129 : vector<8x256xf32>
    %c2_45 = arith.constant 2 : index
    %c0_46 = arith.constant 0 : index
    %c0_47 = arith.constant 0 : index
    %131 = vector.load %arg2[%c2_45, %c0_46, %c0_47] : memref<4x256x256xf32, #tpu.memory_space<vmem>>, vector<1x256x256xf32>
    %132 = vector.shape_cast %131 : vector<1x256x256xf32> to vector<256x256xf32>
    %cst_48 = arith.constant dense<0.000000e+00> : vector<8x256xf32>
    %133 = tpu.matmul %130, %132, %cst_48 {dimension_numbers = #tpu.dot_dimension_numbers<[1], [0], [0], [1], [0, 0, 1, 1], [], []>} : vector<8x256xf32>, vector<256x256xf32>, vector<8x256xf32> -> vector<8x256xf32>
    %c3 = arith.constant 3 : index
    %c0_49 = arith.constant 0 : index
    %134 = vector.load %arg3[%c3, %c0_49] : memref<24x256xf32, #tpu.memory_space<vmem>>, vector<1x256xf32>
    %135 = vector.broadcast %134 : vector<1x256xf32> to vector<8x256xf32>
    %136 = arith.addf %133, %135 : vector<8x256xf32>
    %cst_50 = arith.constant 5.000000e-01 : f32
    %137 = vector.broadcast %cst_50 : f32 to vector<8x256xf32>
    %138 = arith.mulf %137, %136 : vector<8x256xf32>
    %cst_51 = arith.constant 0.707106769 : f32
    %139 = vector.broadcast %cst_51 : f32 to vector<8x256xf32>
    %140 = arith.mulf %136, %139 : vector<8x256xf32>
    %141 = math.erf %140 : vector<8x256xf32>
    %cst_52 = arith.constant 1.000000e+00 : f32
    %142 = vector.broadcast %cst_52 : f32 to vector<8x256xf32>
    %143 = arith.addf %142, %141 : vector<8x256xf32>
    %144 = arith.mulf %138, %143 : vector<8x256xf32>
    %c3_53 = arith.constant 3 : index
    %c0_54 = arith.constant 0 : index
    %c0_55 = arith.constant 0 : index
    %145 = vector.load %arg2[%c3_53, %c0_54, %c0_55] : memref<4x256x256xf32, #tpu.memory_space<vmem>>, vector<1x256x256xf32>
    %146 = vector.shape_cast %145 : vector<1x256x256xf32> to vector<256x256xf32>
    %cst_56 = arith.constant dense<0.000000e+00> : vector<8x256xf32>
    %147 = tpu.matmul %144, %146, %cst_56 {dimension_numbers = #tpu.dot_dimension_numbers<[1], [0], [0], [1], [0, 0, 1, 1], [], []>} : vector<8x256xf32>, vector<256x256xf32>, vector<8x256xf32> -> vector<8x256xf32>
    %c4 = arith.constant 4 : index
    %c0_57 = arith.constant 0 : index
    %148 = vector.load %arg3[%c4, %c0_57] : memref<24x256xf32, #tpu.memory_space<vmem>>, vector<1x256xf32>
    %149 = vector.broadcast %148 : vector<1x256xf32> to vector<8x256xf32>
    %150 = arith.addf %147, %149 : vector<8x256xf32>
    %151 = math.tanh %150 : vector<8x256xf32>
    %152 = vector.extract_strided_slice %151 {offsets = [0, 0], sizes = [8, 128], strides = [1, 1]} : vector<8x256xf32> to vector<8x128xf32>
    %c0_58 = arith.constant 0 : index
    %c0_59 = arith.constant 0 : index
    %c0_60 = arith.constant 0 : index
    %153 = vector.load %arg4[%c0_58, %c0_59, %c0_60] : memref<5x128x128xf32, #tpu.memory_space<vmem>>, vector<1x128x128xf32>
    %154 = vector.shape_cast %153 : vector<1x128x128xf32> to vector<128x128xf32>
    %cst_61 = arith.constant dense<0.000000e+00> : vector<8x128xf32>
    %155 = tpu.matmul %152, %154, %cst_61 {dimension_numbers = #tpu.dot_dimension_numbers<[1], [0], [0], [1], [0, 0, 1, 1], [], []>} : vector<8x128xf32>, vector<128x128xf32>, vector<8x128xf32> -> vector<8x128xf32>
    %c0_62 = arith.constant 0 : index
    %c0_63 = arith.constant 0 : index
    %156 = vector.load %arg5[%c0_62, %c0_63] : memref<24x128xf32, #tpu.memory_space<vmem>>, vector<1x128xf32>
    %157 = vector.broadcast %156 : vector<1x128xf32> to vector<8x128xf32>
    %158 = arith.addf %155, %157 : vector<8x128xf32>
    %c8_64 = arith.constant 8 : index
    %c0_65 = arith.constant 0 : index
    %159 = vector.load %arg5[%c8_64, %c0_65] : memref<24x128xf32, #tpu.memory_space<vmem>>, vector<1x128xf32>
    %c16_66 = arith.constant 16 : index
    %c0_67 = arith.constant 0 : index
    %160 = vector.load %arg5[%c16_66, %c0_67] : memref<24x128xf32, #tpu.memory_space<vmem>>, vector<1x128xf32>
    %161 = arith.mulf %158, %6 : vector<8x128xf32>
    %cst_68 = arith.constant dense<0.000000e+00> : vector<128xf32>
    %162 = vector.multi_reduction <add>, %161, %cst_68 [0] : vector<8x128xf32> to vector<128xf32>
    %163 = vector.shape_cast %162 : vector<128xf32> to vector<1x128xf32>
    %cst_69 = arith.constant 5.000000e-01 : f32
    %164 = vector.broadcast %cst_69 : f32 to vector<1x128xf32>
    %165 = arith.mulf %163, %164 : vector<1x128xf32>
    %166 = vector.broadcast %165 : vector<1x128xf32> to vector<8x128xf32>
    %167 = arith.subf %158, %166 : vector<8x128xf32>
    %168 = arith.mulf %167, %6 : vector<8x128xf32>
    %169 = arith.mulf %168, %168 : vector<8x128xf32>
    %cst_70 = arith.constant dense<0.000000e+00> : vector<128xf32>
    %170 = vector.multi_reduction <add>, %169, %cst_70 [0] : vector<8x128xf32> to vector<128xf32>
    %171 = vector.shape_cast %170 : vector<128xf32> to vector<1x128xf32>
    %cst_71 = arith.constant 5.000000e-01 : f32
    %172 = vector.broadcast %cst_71 : f32 to vector<1x128xf32>
    %173 = arith.mulf %171, %172 : vector<1x128xf32>
    %174 = vector.broadcast %165 : vector<1x128xf32> to vector<8x128xf32>
    %175 = arith.subf %158, %174 : vector<8x128xf32>
    %cst_72 = arith.constant 9.99999974E-6 : f32
    %176 = vector.broadcast %cst_72 : f32 to vector<1x128xf32>
    %177 = arith.addf %173, %176 : vector<1x128xf32>
    %178 = math.rsqrt %177 : vector<1x128xf32>
    %179 = vector.broadcast %178 : vector<1x128xf32> to vector<8x128xf32>
    %180 = arith.mulf %175, %179 : vector<8x128xf32>
    %181 = vector.broadcast %159 : vector<1x128xf32> to vector<8x128xf32>
    %182 = arith.mulf %180, %181 : vector<8x128xf32>
    %183 = vector.broadcast %160 : vector<1x128xf32> to vector<8x128xf32>
    %184 = arith.addf %182, %183 : vector<8x128xf32>
    %cst_73 = arith.constant 5.000000e-01 : f32
    %185 = vector.broadcast %cst_73 : f32 to vector<8x128xf32>
    %186 = arith.mulf %185, %184 : vector<8x128xf32>
    %cst_74 = arith.constant 0.707106769 : f32
    %187 = vector.broadcast %cst_74 : f32 to vector<8x128xf32>
    %188 = arith.mulf %184, %187 : vector<8x128xf32>
    %189 = math.erf %188 : vector<8x128xf32>
    %cst_75 = arith.constant 1.000000e+00 : f32
    %190 = vector.broadcast %cst_75 : f32 to vector<8x128xf32>
    %191 = arith.addf %190, %189 : vector<8x128xf32>
    %192 = arith.mulf %186, %191 : vector<8x128xf32>
    %c1_76 = arith.constant 1 : index
    %c0_77 = arith.constant 0 : index
    %c0_78 = arith.constant 0 : index
    %193 = vector.load %arg4[%c1_76, %c0_77, %c0_78] : memref<5x128x128xf32, #tpu.memory_space<vmem>>, vector<1x128x128xf32>
    %194 = vector.shape_cast %193 : vector<1x128x128xf32> to vector<128x128xf32>
    %cst_79 = arith.constant dense<0.000000e+00> : vector<8x128xf32>
    %195 = tpu.matmul %192, %194, %cst_79 {dimension_numbers = #tpu.dot_dimension_numbers<[1], [0], [0], [1], [0, 0, 1, 1], [], []>} : vector<8x128xf32>, vector<128x128xf32>, vector<8x128xf32> -> vector<8x128xf32>
    %c1_80 = arith.constant 1 : index
    %c0_81 = arith.constant 0 : index
    %196 = vector.load %arg5[%c1_80, %c0_81] : memref<24x128xf32, #tpu.memory_space<vmem>>, vector<1x128xf32>
    %197 = vector.broadcast %196 : vector<1x128xf32> to vector<8x128xf32>
    %198 = arith.addf %195, %197 : vector<8x128xf32>
    %c9_82 = arith.constant 9 : index
    %c0_83 = arith.constant 0 : index
    %199 = vector.load %arg5[%c9_82, %c0_83] : memref<24x128xf32, #tpu.memory_space<vmem>>, vector<1x128xf32>
    %c17_84 = arith.constant 17 : index
    %c0_85 = arith.constant 0 : index
    %200 = vector.load %arg5[%c17_84, %c0_85] : memref<24x128xf32, #tpu.memory_space<vmem>>, vector<1x128xf32>
    %201 = arith.mulf %198, %6 : vector<8x128xf32>
    %cst_86 = arith.constant dense<0.000000e+00> : vector<128xf32>
    %202 = vector.multi_reduction <add>, %201, %cst_86 [0] : vector<8x128xf32> to vector<128xf32>
    %203 = vector.shape_cast %202 : vector<128xf32> to vector<1x128xf32>
    %cst_87 = arith.constant 5.000000e-01 : f32
    %204 = vector.broadcast %cst_87 : f32 to vector<1x128xf32>
    %205 = arith.mulf %203, %204 : vector<1x128xf32>
    %206 = vector.broadcast %205 : vector<1x128xf32> to vector<8x128xf32>
    %207 = arith.subf %198, %206 : vector<8x128xf32>
    %208 = arith.mulf %207, %6 : vector<8x128xf32>
    %209 = arith.mulf %208, %208 : vector<8x128xf32>
    %cst_88 = arith.constant dense<0.000000e+00> : vector<128xf32>
    %210 = vector.multi_reduction <add>, %209, %cst_88 [0] : vector<8x128xf32> to vector<128xf32>
    %211 = vector.shape_cast %210 : vector<128xf32> to vector<1x128xf32>
    %cst_89 = arith.constant 5.000000e-01 : f32
    %212 = vector.broadcast %cst_89 : f32 to vector<1x128xf32>
    %213 = arith.mulf %211, %212 : vector<1x128xf32>
    %214 = vector.broadcast %205 : vector<1x128xf32> to vector<8x128xf32>
    %215 = arith.subf %198, %214 : vector<8x128xf32>
    %cst_90 = arith.constant 9.99999974E-6 : f32
    %216 = vector.broadcast %cst_90 : f32 to vector<1x128xf32>
    %217 = arith.addf %213, %216 : vector<1x128xf32>
    %218 = math.rsqrt %217 : vector<1x128xf32>
    %219 = vector.broadcast %218 : vector<1x128xf32> to vector<8x128xf32>
    %220 = arith.mulf %215, %219 : vector<8x128xf32>
    %221 = vector.broadcast %199 : vector<1x128xf32> to vector<8x128xf32>
    %222 = arith.mulf %220, %221 : vector<8x128xf32>
    %223 = vector.broadcast %200 : vector<1x128xf32> to vector<8x128xf32>
    %224 = arith.addf %222, %223 : vector<8x128xf32>
    %cst_91 = arith.constant 5.000000e-01 : f32
    %225 = vector.broadcast %cst_91 : f32 to vector<8x128xf32>
    %226 = arith.mulf %225, %224 : vector<8x128xf32>
    %cst_92 = arith.constant 0.707106769 : f32
    %227 = vector.broadcast %cst_92 : f32 to vector<8x128xf32>
    %228 = arith.mulf %224, %227 : vector<8x128xf32>
    %229 = math.erf %228 : vector<8x128xf32>
    %cst_93 = arith.constant 1.000000e+00 : f32
    %230 = vector.broadcast %cst_93 : f32 to vector<8x128xf32>
    %231 = arith.addf %230, %229 : vector<8x128xf32>
    %232 = arith.mulf %226, %231 : vector<8x128xf32>
    %c2_94 = arith.constant 2 : index
    %c0_95 = arith.constant 0 : index
    %c0_96 = arith.constant 0 : index
    %233 = vector.load %arg4[%c2_94, %c0_95, %c0_96] : memref<5x128x128xf32, #tpu.memory_space<vmem>>, vector<1x128x128xf32>
    %234 = vector.shape_cast %233 : vector<1x128x128xf32> to vector<128x128xf32>
    %cst_97 = arith.constant dense<0.000000e+00> : vector<8x128xf32>
    %235 = tpu.matmul %232, %234, %cst_97 {dimension_numbers = #tpu.dot_dimension_numbers<[1], [0], [0], [1], [0, 0, 1, 1], [], []>} : vector<8x128xf32>, vector<128x128xf32>, vector<8x128xf32> -> vector<8x128xf32>
    %c2_98 = arith.constant 2 : index
    %c0_99 = arith.constant 0 : index
    %236 = vector.load %arg5[%c2_98, %c0_99] : memref<24x128xf32, #tpu.memory_space<vmem>>, vector<1x128xf32>
    %237 = vector.broadcast %236 : vector<1x128xf32> to vector<8x128xf32>
    %238 = arith.addf %235, %237 : vector<8x128xf32>
    %c10_100 = arith.constant 10 : index
    %c0_101 = arith.constant 0 : index
    %239 = vector.load %arg5[%c10_100, %c0_101] : memref<24x128xf32, #tpu.memory_space<vmem>>, vector<1x128xf32>
    %c18_102 = arith.constant 18 : index
    %c0_103 = arith.constant 0 : index
    %240 = vector.load %arg5[%c18_102, %c0_103] : memref<24x128xf32, #tpu.memory_space<vmem>>, vector<1x128xf32>
    %241 = arith.mulf %238, %6 : vector<8x128xf32>
    %cst_104 = arith.constant dense<0.000000e+00> : vector<128xf32>
    %242 = vector.multi_reduction <add>, %241, %cst_104 [0] : vector<8x128xf32> to vector<128xf32>
    %243 = vector.shape_cast %242 : vector<128xf32> to vector<1x128xf32>
    %cst_105 = arith.constant 5.000000e-01 : f32
    %244 = vector.broadcast %cst_105 : f32 to vector<1x128xf32>
    %245 = arith.mulf %243, %244 : vector<1x128xf32>
    %246 = vector.broadcast %245 : vector<1x128xf32> to vector<8x128xf32>
    %247 = arith.subf %238, %246 : vector<8x128xf32>
    %248 = arith.mulf %247, %6 : vector<8x128xf32>
    %249 = arith.mulf %248, %248 : vector<8x128xf32>
    %cst_106 = arith.constant dense<0.000000e+00> : vector<128xf32>
    %250 = vector.multi_reduction <add>, %249, %cst_106 [0] : vector<8x128xf32> to vector<128xf32>
    %251 = vector.shape_cast %250 : vector<128xf32> to vector<1x128xf32>
    %cst_107 = arith.constant 5.000000e-01 : f32
    %252 = vector.broadcast %cst_107 : f32 to vector<1x128xf32>
    %253 = arith.mulf %251, %252 : vector<1x128xf32>
    %254 = vector.broadcast %245 : vector<1x128xf32> to vector<8x128xf32>
    %255 = arith.subf %238, %254 : vector<8x128xf32>
    %cst_108 = arith.constant 9.99999974E-6 : f32
    %256 = vector.broadcast %cst_108 : f32 to vector<1x128xf32>
    %257 = arith.addf %253, %256 : vector<1x128xf32>
    %258 = math.rsqrt %257 : vector<1x128xf32>
    %259 = vector.broadcast %258 : vector<1x128xf32> to vector<8x128xf32>
    %260 = arith.mulf %255, %259 : vector<8x128xf32>
    %261 = vector.broadcast %239 : vector<1x128xf32> to vector<8x128xf32>
    %262 = arith.mulf %260, %261 : vector<8x128xf32>
    %263 = vector.broadcast %240 : vector<1x128xf32> to vector<8x128xf32>
    %264 = arith.addf %262, %263 : vector<8x128xf32>
    %cst_109 = arith.constant 5.000000e-01 : f32
    %265 = vector.broadcast %cst_109 : f32 to vector<8x128xf32>
    %266 = arith.mulf %265, %264 : vector<8x128xf32>
    %cst_110 = arith.constant 0.707106769 : f32
    %267 = vector.broadcast %cst_110 : f32 to vector<8x128xf32>
    %268 = arith.mulf %264, %267 : vector<8x128xf32>
    %269 = math.erf %268 : vector<8x128xf32>
    %cst_111 = arith.constant 1.000000e+00 : f32
    %270 = vector.broadcast %cst_111 : f32 to vector<8x128xf32>
    %271 = arith.addf %270, %269 : vector<8x128xf32>
    %272 = arith.mulf %266, %271 : vector<8x128xf32>
    %c3_112 = arith.constant 3 : index
    %c0_113 = arith.constant 0 : index
    %c0_114 = arith.constant 0 : index
    %273 = vector.load %arg4[%c3_112, %c0_113, %c0_114] : memref<5x128x128xf32, #tpu.memory_space<vmem>>, vector<1x128x128xf32>
    %274 = vector.shape_cast %273 : vector<1x128x128xf32> to vector<128x128xf32>
    %cst_115 = arith.constant dense<0.000000e+00> : vector<8x128xf32>
    %275 = tpu.matmul %272, %274, %cst_115 {dimension_numbers = #tpu.dot_dimension_numbers<[1], [0], [0], [1], [0, 0, 1, 1], [], []>} : vector<8x128xf32>, vector<128x128xf32>, vector<8x128xf32> -> vector<8x128xf32>
    %c3_116 = arith.constant 3 : index
    %c0_117 = arith.constant 0 : index
    %276 = vector.load %arg5[%c3_116, %c0_117] : memref<24x128xf32, #tpu.memory_space<vmem>>, vector<1x128xf32>
    %277 = vector.broadcast %276 : vector<1x128xf32> to vector<8x128xf32>
    %278 = arith.addf %275, %277 : vector<8x128xf32>
    %c11 = arith.constant 11 : index
    %c0_118 = arith.constant 0 : index
    %279 = vector.load %arg5[%c11, %c0_118] : memref<24x128xf32, #tpu.memory_space<vmem>>, vector<1x128xf32>
    %c19 = arith.constant 19 : index
    %c0_119 = arith.constant 0 : index
    %280 = vector.load %arg5[%c19, %c0_119] : memref<24x128xf32, #tpu.memory_space<vmem>>, vector<1x128xf32>
    %281 = arith.mulf %278, %6 : vector<8x128xf32>
    %cst_120 = arith.constant dense<0.000000e+00> : vector<128xf32>
    %282 = vector.multi_reduction <add>, %281, %cst_120 [0] : vector<8x128xf32> to vector<128xf32>
    %283 = vector.shape_cast %282 : vector<128xf32> to vector<1x128xf32>
    %cst_121 = arith.constant 5.000000e-01 : f32
    %284 = vector.broadcast %cst_121 : f32 to vector<1x128xf32>
    %285 = arith.mulf %283, %284 : vector<1x128xf32>
    %286 = vector.broadcast %285 : vector<1x128xf32> to vector<8x128xf32>
    %287 = arith.subf %278, %286 : vector<8x128xf32>
    %288 = arith.mulf %287, %6 : vector<8x128xf32>
    %289 = arith.mulf %288, %288 : vector<8x128xf32>
    %cst_122 = arith.constant dense<0.000000e+00> : vector<128xf32>
    %290 = vector.multi_reduction <add>, %289, %cst_122 [0] : vector<8x128xf32> to vector<128xf32>
    %291 = vector.shape_cast %290 : vector<128xf32> to vector<1x128xf32>
    %cst_123 = arith.constant 5.000000e-01 : f32
    %292 = vector.broadcast %cst_123 : f32 to vector<1x128xf32>
    %293 = arith.mulf %291, %292 : vector<1x128xf32>
    %294 = vector.broadcast %285 : vector<1x128xf32> to vector<8x128xf32>
    %295 = arith.subf %278, %294 : vector<8x128xf32>
    %cst_124 = arith.constant 9.99999974E-6 : f32
    %296 = vector.broadcast %cst_124 : f32 to vector<1x128xf32>
    %297 = arith.addf %293, %296 : vector<1x128xf32>
    %298 = math.rsqrt %297 : vector<1x128xf32>
    %299 = vector.broadcast %298 : vector<1x128xf32> to vector<8x128xf32>
    %300 = arith.mulf %295, %299 : vector<8x128xf32>
    %301 = vector.broadcast %279 : vector<1x128xf32> to vector<8x128xf32>
    %302 = arith.mulf %300, %301 : vector<8x128xf32>
    %303 = vector.broadcast %280 : vector<1x128xf32> to vector<8x128xf32>
    %304 = arith.addf %302, %303 : vector<8x128xf32>
    %305 = arith.select %11, %304, %278 : vector<8x128xi1>, vector<8x128xf32>
    %cst_125 = arith.constant 5.000000e-01 : f32
    %306 = vector.broadcast %cst_125 : f32 to vector<8x128xf32>
    %307 = arith.mulf %306, %305 : vector<8x128xf32>
    %cst_126 = arith.constant 0.707106769 : f32
    %308 = vector.broadcast %cst_126 : f32 to vector<8x128xf32>
    %309 = arith.mulf %305, %308 : vector<8x128xf32>
    %310 = math.erf %309 : vector<8x128xf32>
    %cst_127 = arith.constant 1.000000e+00 : f32
    %311 = vector.broadcast %cst_127 : f32 to vector<8x128xf32>
    %312 = arith.addf %311, %310 : vector<8x128xf32>
    %313 = arith.mulf %307, %312 : vector<8x128xf32>
    %314 = math.tanh %305 : vector<8x128xf32>
    %315 = arith.select %11, %313, %314 : vector<8x128xi1>, vector<8x128xf32>
    %c4_128 = arith.constant 4 : index
    %c0_129 = arith.constant 0 : index
    %c0_130 = arith.constant 0 : index
    %316 = vector.load %arg4[%c4_128, %c0_129, %c0_130] : memref<5x128x128xf32, #tpu.memory_space<vmem>>, vector<1x128x128xf32>
    %317 = vector.shape_cast %316 : vector<1x128x128xf32> to vector<128x128xf32>
    %cst_131 = arith.constant dense<0.000000e+00> : vector<8x128xf32>
    %318 = tpu.matmul %315, %317, %cst_131 {dimension_numbers = #tpu.dot_dimension_numbers<[1], [0], [0], [1], [0, 0, 1, 1], [], []>} : vector<8x128xf32>, vector<128x128xf32>, vector<8x128xf32> -> vector<8x128xf32>
    %c4_132 = arith.constant 4 : index
    %c0_133 = arith.constant 0 : index
    %319 = vector.load %arg5[%c4_132, %c0_133] : memref<24x128xf32, #tpu.memory_space<vmem>>, vector<1x128xf32>
    %320 = vector.broadcast %319 : vector<1x128xf32> to vector<8x128xf32>
    %321 = arith.addf %318, %320 : vector<8x128xf32>
    %cst_134 = arith.constant -1.000000e+30 : f32
    %322 = vector.broadcast %cst_134 : f32 to vector<8x128xf32>
    %323 = arith.select %9, %321, %322 : vector<8x128xi1>, vector<8x128xf32>
    %cst_135 = arith.constant dense<0xFF800000> : vector<8xf32>
    %324 = vector.multi_reduction <maximumf>, %323, %cst_135 [1] : vector<8x128xf32> to vector<8xf32>
    %325 = vector.shape_cast %324 : vector<8xf32> to vector<8x1xf32>
    %326 = vector.broadcast %325 : vector<8x1xf32> to vector<8x128xf32>
    %327 = arith.subf %323, %326 : vector<8x128xf32>
    %328 = math.exp %327 : vector<8x128xf32>
    %cst_136 = arith.constant 0.000000e+00 : f32
    %329 = vector.broadcast %cst_136 : f32 to vector<8x128xf32>
    %330 = arith.select %9, %328, %329 : vector<8x128xi1>, vector<8x128xf32>
    %cst_137 = arith.constant dense<0.000000e+00> : vector<8xf32>
    %331 = vector.multi_reduction <add>, %330, %cst_137 [1] : vector<8x128xf32> to vector<8xf32>
    %332 = vector.shape_cast %331 : vector<8xf32> to vector<8x1xf32>
    %333 = vector.broadcast %332 : vector<8x1xf32> to vector<8x128xf32>
    %334 = arith.divf %330, %333 : vector<8x128xf32>
    %cst_138 = arith.constant -1.000000e+30 : f32
    %335 = vector.broadcast %cst_138 : f32 to vector<8x128xf32>
    %336 = arith.select %9, %334, %335 : vector<8x128xi1>, vector<8x128xf32>
    %cst_139 = arith.constant dense<0xFF800000> : vector<8xf32>
    %337 = vector.multi_reduction <maximumf>, %336, %cst_139 [1] : vector<8x128xf32> to vector<8xf32>
    %338 = vector.shape_cast %337 : vector<8xf32> to vector<8x1xf32>
    %339 = vector.broadcast %338 : vector<8x1xf32> to vector<8x128xf32>
    %340 = arith.subf %336, %339 : vector<8x128xf32>
    %341 = math.exp %340 : vector<8x128xf32>
    %cst_140 = arith.constant 0.000000e+00 : f32
    %342 = vector.broadcast %cst_140 : f32 to vector<8x128xf32>
    %343 = arith.select %9, %341, %342 : vector<8x128xi1>, vector<8x128xf32>
    %cst_141 = arith.constant dense<0.000000e+00> : vector<8xf32>
    %344 = vector.multi_reduction <add>, %343, %cst_141 [1] : vector<8x128xf32> to vector<8xf32>
    %345 = vector.shape_cast %344 : vector<8xf32> to vector<8x1xf32>
    %346 = vector.broadcast %345 : vector<8x1xf32> to vector<8x128xf32>
    %347 = arith.divf %343, %346 : vector<8x128xf32>
    %348 = tpu.concatenate %334, %347, %321 in 1 : vector<8x128xf32>, vector<8x128xf32>, vector<8x128xf32> -> vector<8x384xf32>
    %c0_142 = arith.constant 0 : index
    %c0_143 = arith.constant 0 : index
    %349 = vector.load %arg6[%c0_142, %c0_143] : memref<8x384xf32, #tpu.memory_space<vmem>>, vector<8x384xf32>
    tpu.vector_store %arg6[%c0_142, %c0_143], %348 {strides = array<i32>} : memref<8x384xf32, #tpu.memory_space<vmem>>, vector<8x384xf32>,
    return
  }
}

</mosaic_0001>

<bundles_post_ra>
// kernel: tpu_custom_call.1
= control target key start
LH: loop header
LB: loop body
LE: loop exit
PB: predicated region body
PF: predicated region fallthrough
CT: control target
= control target key end

     0   :  { %11 = vsyncpa [#allocation3], 0  ;;  %s2895_s0 = inlined_call_operand.hbm [shape: f32[8,128], index: 0, kind: input, shape index: {}]   ;;  %s2896_s1 = inlined_call_operand.hbm [shape: f32[128,256], index: 1, kind: input, shape index: {}]   ;;  %s2897_s2 = inlined_call_operand.hbm [shape: f32[4,256,256], index: 2, kind: input, shape index: {}]   ;;  %s2898_s3 = inlined_call_operand.hbm [shape: f32[24,256], index: 3, kind: input, shape index: {}]   ;;  %s2899_s4 = inlined_call_operand.hbm [shape: f32[5,128,128], index: 4, kind: input, shape index: {}]   ;;  %s2900_s5 = inlined_call_operand.hbm [shape: f32[24,128], index: 5, kind: input, shape index: {}]   ;;  %s2901_s6 = inlined_call_operand.hbm [shape: f32[8,384], index: 6, kind: output, shape index: {}]  }
   0x1   :  { %12 = vsyncpa [#allocation6], 0 }
   0x2   :  { %13 = vsyncpa [#allocation9], 0 }
   0x3   :  { %14 = vsyncpa [#allocation12], 0 }
   0x4   :  { %15 = vsyncpa [#allocation4], 0  ;;  %s2648_s21 = smov [#allocation5]   ;;  %s2484_s25 = scalar_lea.hbm %s2896_s1, 4096 }
   0x5   :  { %s31_s22 = sshll.u32 %s2648_s21, 4  ;;  %p2485_p0 = scmp.ne.s32.totalorder %s2896_s1, %s2484_s25  ;;  %s32_s22 = int_to_ptr.vmem [resolvable:$true] %s31_s22 }
   0x6   :  { %p2488_p1 = scmp.lt.u32.totalorder %s2484_s25, %s2896_s1 }
   0x8   :  { %p2490_p2 = pnand %p2488_p1, %p2485_p0 }
   0xa   :  { %2493 = shalt.err (!%p2490_p2)
}
   0xb   :  { %s2494_s30 = scalar_lea.vmem %s32_s22, 4096  ;;  %p2499_p4 = scmp.lt.s32.totalorder %s32_s22, %s32_s22 }
   0xc   :  { %p2495_p3 = scmp.ne.s32.totalorder %s32_s22, %s2494_s30  ;;  %p2500_p5 = scmp.lt.s32.totalorder %s2494_s30, %s2494_s30 }
   0xe   :  { %p2501_p6 = por %p2500_p5, %p2499_p4 }
  0x10   :  { %p2502_p7 = pnand %p2501_p6, %p2495_p3 }
  0x12   :  { %2505 = shalt.err (!%p2502_p7)
}
  0x13   :  { %s2649_s7 = smov 256   ;;  %s2650_s8 = smov 16  }
  0x14   :  { %37 = dma.hbm_to_vmem [thread:$0]  %s2896_s1, 4096, %s32_s22, [#allocation6], %s2649_s7, %s2649_s7, %s2650_s8  }
  0x15   :  { %s2651_s11 = smov [#allocation8]   ;;  %s2652_s13 = smov [#allocation2]  }
  0x16   :  { %s55_s12 = sshll.u32 %s2651_s11, 4  ;;  %s22_s14 = sshll.u32 %s2652_s13, 4  ;;  %s56_s12 = int_to_ptr.vmem [resolvable:$true] %s55_s12  ;;  %s23_s14 = int_to_ptr.vmem [resolvable:$true] %s22_s14 }
  0x17   :  { %s2506_s17 = scalar_lea.hbm %s2898_s3, 768 }
  0x18   :  { %p2507_p8 = scmp.ne.s32.totalorder %s2898_s3, %s2506_s17  ;;  %p2510_p9 = scmp.lt.u32.totalorder %s2506_s17, %s2898_s3 }
  0x1a   :  { %p2512_p10 = pnand %p2510_p9, %p2507_p8 }
  0x1c   :  { %2515 = shalt.err (!%p2512_p10)
}
  0x1d   :  { %s2516_s1 = scalar_lea.vmem %s56_s12, 768  ;;  %p2521_p12 = scmp.lt.s32.totalorder %s56_s12, %s56_s12 }
  0x1e   :  { %p2517_p11 = scmp.ne.s32.totalorder %s56_s12, %s2516_s1  ;;  %p2522_p13 = scmp.lt.s32.totalorder %s2516_s1, %s2516_s1 }
  0x20   :  { %p2523_p0 = por %p2522_p13, %p2521_p12 }
  0x22   :  { %p2524_p1 = pnand %p2523_p0, %p2517_p11 }
  0x24   :  { %2527 = shalt.err (!%p2524_p1)
}
  0x25   :  { %61 = dma.hbm_to_vmem [thread:$0]  %s2898_s3, 768, %s56_s12, [#allocation9], %s2649_s7, %s2649_s7, %s2650_s8  }
  0x26   :  { %s2528_s26 = scalar_lea.hbm %s2895_s0, 128 }
  0x27   :  { %p2529_p2 = scmp.ne.s32.totalorder %s2895_s0, %s2528_s26  ;;  %p2532_p3 = scmp.lt.u32.totalorder %s2528_s26, %s2895_s0 }
  0x29   :  { %p2534_p4 = pnand %p2532_p3, %p2529_p2 }
  0x2b   :  { %2537 = shalt.err (!%p2534_p4)
}
  0x2c   :  { %s2538_s9 = scalar_lea.vmem %s23_s14, 128  ;;  %p2543_p6 = scmp.lt.s32.totalorder %s23_s14, %s23_s14 }
  0x2d   :  { %p2539_p5 = scmp.ne.s32.totalorder %s23_s14, %s2538_s9  ;;  %p2544_p7 = scmp.lt.s32.totalorder %s2538_s9, %s2538_s9 }
  0x2f   :  { %p2545_p8 = por %p2544_p7, %p2543_p6 }
  0x31   :  { %p2546_p9 = pnand %p2545_p8, %p2539_p5 }
  0x33   :  { %2549 = shalt.err (!%p2546_p9)
}
  0x34   :  { %25 = dma.hbm_to_vmem [thread:$0]  %s2895_s0, 128, %s23_s14, [#allocation3]  }
  0x35   :  { %s2653_s11 = smov [#allocation7]   ;;  %s2654_s13 = smov [#allocation10]  }
  0x36   :  { %s43_s12 = sshll.u32 %s2653_s11, 4  ;;  %s67_s15 = sshll.u32 %s2654_s13, 4  ;;  %s44_s12 = int_to_ptr.vmem [resolvable:$true] %s43_s12  ;;  %s68_s15 = int_to_ptr.vmem [resolvable:$true] %s67_s15 }
  0x37   :  { %s2550_s18 = scalar_lea.hbm %s2897_s2, 32768 }
  0x38   :  { %p2551_p10 = scmp.ne.s32.totalorder %s2897_s2, %s2550_s18  ;;  %p2554_p11 = scmp.lt.u32.totalorder %s2550_s18, %s2897_s2 }
  0x3a   :  { %p2556_p12 = pnand %p2554_p11, %p2551_p10 }
  0x3c   :  { %2559 = shalt.err (!%p2556_p12)
}
  0x3d   :  { %s2560_s0 = scalar_lea.vmem %s44_s12, 32768  ;;  %p2565_p0 = scmp.lt.s32.totalorder %s44_s12, %s44_s12 }
  0x3e   :  { %p2561_p13 = scmp.ne.s32.totalorder %s44_s12, %s2560_s0  ;;  %p2566_p1 = scmp.lt.s32.totalorder %s2560_s0, %s2560_s0 }
  0x40   :  { %p2567_p2 = por %p2566_p1, %p2565_p0 }
  0x42   :  { %p2568_p3 = pnand %p2567_p2, %p2561_p13 }
  0x44   :  { %2571 = shalt.err (!%p2568_p3)
}
  0x45   :  { %49 = dma.hbm_to_vmem [thread:$0]  %s2897_s2, 32768, %s44_s12, [#allocation6], %s2649_s7, %s2649_s7, %s2650_s8  }
  0x46   :  { %s2572_s25 = scalar_lea.hbm %s2899_s4, 10240 }
  0x47   :  { %p2573_p4 = scmp.ne.s32.totalorder %s2899_s4, %s2572_s25  ;;  %p2576_p5 = scmp.lt.u32.totalorder %s2572_s25, %s2899_s4 }
  0x49   :  { %p2578_p6 = pnand %p2576_p5, %p2573_p4 }
  0x4b   :  { %2581 = shalt.err (!%p2578_p6)
}
  0x4c   :  { %s2582_s30 = scalar_lea.vmem %s68_s15, 10240  ;;  %p2587_p8 = scmp.lt.s32.totalorder %s68_s15, %s68_s15 }
  0x4d   :  { %p2583_p7 = scmp.ne.s32.totalorder %s68_s15, %s2582_s30  ;;  %p2588_p9 = scmp.lt.s32.totalorder %s2582_s30, %s2582_s30 }
  0x4f   :  { %p2589_p10 = por %p2588_p9, %p2587_p8 }
  0x51   :  { %p2590_p11 = pnand %p2589_p10, %p2583_p7 }
  0x53   :  { %2593 = shalt.err (!%p2590_p11)
}
  0x54   :  { %s2655_s2 = smov 128   ;;  %s2656_s7 = smov 8  }
  0x55   :  { %73 = dma.hbm_to_vmem [thread:$0]  %s2899_s4, 10240, %s68_s15, [#allocation9], %s2655_s2, %s2655_s2, %s2656_s7  }
  0x56   :  { %s2657_s3 = smov [#allocation11]   ;;  %s2594_s13 = scalar_lea.hbm %s2900_s5, 384 }
  0x57   :  { %s79_s10 = sshll.u32 %s2657_s3, 4  ;;  %p2595_p12 = scmp.ne.s32.totalorder %s2900_s5, %s2594_s13  ;;  %s80_s10 = int_to_ptr.vmem [resolvable:$true] %s79_s10 }
  0x58   :  { %p2598_p13 = scmp.lt.u32.totalorder %s2594_s13, %s2900_s5 }
  0x5a   :  { %p2600_p0 = pnand %p2598_p13, %p2595_p12 }
  0x5c   :  { %2603 = shalt.err (!%p2600_p0)
}
  0x5d   :  { %s2604_s20 = scalar_lea.vmem %s80_s10, 384  ;;  %p2609_p2 = scmp.lt.s32.totalorder %s80_s10, %s80_s10 }
  0x5e   :  { %p2605_p1 = scmp.ne.s32.totalorder %s80_s10, %s2604_s20  ;;  %p2610_p3 = scmp.lt.s32.totalorder %s2604_s20, %s2604_s20 }
  0x60   :  { %p2611_p4 = por %p2610_p3, %p2609_p2 }
  0x62   :  { %p2612_p5 = pnand %p2611_p4, %p2605_p1 }
  0x64   :  { %2615 = shalt.err (!%p2612_p5)
}
  0x65   :  { %85 = dma.hbm_to_vmem [thread:$0]  %s2900_s5, 384, %s80_s10, [#allocation12], %s2655_s2, %s2655_s2, %s2656_s7  }
  0x66   :  { %2638 = dma.done.wait [#allocation3], 128  }
  0x67   :  { %2639 = vsyncadd [#allocation3], 4294967168 }
  0x68   :  { %2640 = dma.done.wait [#allocation6], 36864  }
  0x69   :  { %2641 = vsyncadd [#allocation6], 4294930432 }
  0x6a   :  { %2642 = dma.done.wait [#allocation9], 11008  }
  0x6b   :  { %2643 = vsyncadd [#allocation9], 4294956288 }
  0x6c   :  { %2644 = dma.done.wait [#allocation12], 384  }
  0x6d   :  { %2645 = vsyncadd [#allocation12], 4294966912  ;;  %v2658_v0 = vmov 0.0   ;;  %v115_v1 = vld [vmem:[#allocation5 + $0x8] sm:$0xff]  ;;  %v117_v2 = vld [vmem:[#allocation5 + $0x18] sm:$0xff]  ;;  %vm2660_vm1 = vmmov 0  }
  0x6e   :  { %222 = vmatprep.mubr.f32.mxu0 %v2658_v0  ;;  %v114_v3 = vld [vmem:[#allocation5] sm:$0xff]  ;;  %v2006_v4 = vpack.c.bf16 %v117_v2, %v115_v1  ;;  %v116_v5 = vld [vmem:[#allocation5 + $0x10] sm:$0xff]  ;;  %v119_v6 = vld [vmem:[#allocation5 + $0x28] sm:$0xff]  ;;  %s2661_s5 = smov [#allocation13]  }
  0x6f   :  { %v121_v7 = vld [vmem:[#allocation5 + $0x38] sm:$0xff]  ;;  %v2008_v8 = vpack.c.bf16 %v116_v5, %v114_v3  ;;  %v118_v10 = vld [vmem:[#allocation5 + $0x20] sm:$0xff]  ;;  %v120_v11 = vld [vmem:[#allocation5 + $0x30] sm:$0xff]  ;;  %s1720_s21 = sshll.u32 %s2661_s5, 4  ;;  %s1721_s21 = int_to_ptr.vmem [resolvable:$true] %s1720_s21 }
  0x70   :  { %v2010_v9 = vpack.c.bf16 %v121_v7, %v119_v6  ;;  %v123_v12 = vld [vmem:[#allocation5 + $0x48] sm:$0xff]  ;;  %2007 = vmatprep.subr.bf16.mxu0 %v2006_v4  ;;  %v125_v13 = vld [vmem:[#allocation5 + $0x58] sm:$0xff]  ;;  %v2012_v14 = vpack.c.bf16 %v120_v11, %v118_v10  ;;  %v122_v16 = vld [vmem:[#allocation5 + $0x40] sm:$0xff]  ;;  %s2616_s1 = scalar_lea.vmem %s1721_s21, 384  ;;  %p2621_p7 = scmp.lt.s32.totalorder %s1721_s21, %s1721_s21 }
  0x71   :  { %2009 = vmatpush1.bf16.msra.mxu0 %v2008_v8  ;;  %v2014_v15 = vpack.c.bf16 %v125_v13, %v123_v12  ;;  %v124_v17 = vld [vmem:[#allocation5 + $0x50] sm:$0xff]  ;;  %v127_v18 = vld [vmem:[#allocation5 + $0x68] sm:$0xff]  ;;  %v129_v19 = vld [vmem:[#allocation5 + $0x78] sm:$0xff]  ;;  %p2617_p6 = scmp.ne.s32.totalorder %s1721_s21, %s2616_s1  ;;  %p2622_p8 = scmp.lt.s32.totalorder %s2616_s1, %s2616_s1 }
  0x72   :  { %2011 = vmatprep.subr.bf16.mxu0 %v2010_v9  ;;  %v2016_v20 = vpack.c.bf16 %v124_v17, %v122_v16  ;;  %v2018_v21 = vpack.c.bf16 %v129_v19, %v127_v18  ;;  %v126_v22 = vld [vmem:[#allocation5 + $0x60] sm:$0xff]  ;;  %v128_v23 = vld [vmem:[#allocation5 + $0x70] sm:$0xff]  ;;  %v131_v24 = vld [vmem:[#allocation5 + $0x88] sm:$0xff] }
  0x73   :  { %v133_v25 = vld [vmem:[#allocation5 + $0x98] sm:$0xff]  ;;  %v2020_v26 = vpack.c.bf16 %v128_v23, %v126_v22  ;;  %v130_v28 = vld [vmem:[#allocation5 + $0x80] sm:$0xff]  ;;  %v132_v29 = vld [vmem:[#allocation5 + $0x90] sm:$0xff]  ;;  %p2623_p9 = por %p2622_p8, %p2621_p7 }
  0x74   :  { %v2022_v27 = vpack.c.bf16 %v133_v25, %v131_v24  ;;  %v135_v30 = vld [vmem:[#allocation5 + $0xa8] sm:$0xff]  ;;  %v137_v31 = vld [vmem:[#allocation5 + $0xb8] sm:$0xff]  ;;  %v2024_v32 = vpack.c.bf16 %v132_v29, %v130_v28  ;;  %v134_v34 = vld [vmem:[#allocation5 + $0xa0] sm:$0xff] }
  0x75   :  { %2013 = vmatpush1.bf16.msra.mxu0 %v2012_v14  ;;  %v2026_v33 = vpack.c.bf16 %v137_v31, %v135_v30  ;;  %v136_v35 = vld [vmem:[#allocation5 + $0xb0] sm:$0xff]  ;;  %v139_v36 = vld [vmem:[#allocation5 + $0xc8] sm:$0xff]  ;;  %v141_v37 = vld [vmem:[#allocation5 + $0xd8] sm:$0xff]  ;;  %p2624_p10 = pnand %p2623_p9, %p2617_p6 }
  0x76   :  { %2015 = vmatprep.subr.bf16.mxu0 %v2014_v15  ;;  %v2028_v38 = vpack.c.bf16 %v136_v35, %v134_v34  ;;  %v2030_v39 = vpack.c.bf16 %v141_v37, %v139_v36  ;;  %v138_v40 = vld [vmem:[#allocation5 + $0xc0] sm:$0xff]  ;;  %v140_v41 = vld [vmem:[#allocation5 + $0xd0] sm:$0xff]  ;;  %v143_v42 = vld [vmem:[#allocation5 + $0xe8] sm:$0xff] }
  0x77   :  { %v145_v43 = vld [vmem:[#allocation5 + $0xf8] sm:$0xff]  ;;  %v2032_v44 = vpack.c.bf16 %v140_v41, %v138_v40  ;;  %v142_v46 = vld [vmem:[#allocation5 + $0xe0] sm:$0xff]  ;;  %v144_v47 = vld [vmem:[#allocation5 + $0xf0] sm:$0xff] }
  0x78   :  { %v2034_v45 = vpack.c.bf16 %v145_v43, %v143_v42  ;;  %v2036_v48 = vpack.c.bf16 %v144_v47, %v142_v46  ;;  %v104_v49 = vld [vmem:[#allocation2] sm:$0xff]  ;;  %v312_v50 = vld [vmem:[#allocation7 + $0x8] sm:$0xff]  ;;  %v311_v53 = vld [vmem:[#allocation7] sm:$0xff] }
  0x79   :  { %2017 = vmatpush1.bf16.msra.mxu0 %v2016_v20  ;;  %v314_v51 = vld [vmem:[#allocation7 + $0x18] sm:$0xff]  ;;  %v313_v54 = vld [vmem:[#allocation7 + $0x10] sm:$0xff]  ;;  %v316_v56 = vld [vmem:[#allocation7 + $0x28] sm:$0xff] }
  0x7a   :  { %2019 = vmatprep.subr.bf16.mxu0 %v2018_v21  ;;  %v2038_v52 = vpack.c.bf16 %v314_v51, %v312_v50  ;;  %v2040_v55 = vpack.c.bf16 %v313_v54, %v311_v53  ;;  %v318_v57 = vld [vmem:[#allocation7 + $0x38] sm:$0xff]  ;;  %v315_v59 = vld [vmem:[#allocation7 + $0x20] sm:$0xff]  ;;  %v317_v60 = vld [vmem:[#allocation7 + $0x30] sm:$0xff] }
  0x7b   :  { %v2042_v58 = vpack.c.bf16 %v318_v57, %v316_v56  ;;  %v2044_v61 = vpack.c.bf16 %v317_v60, %v315_v59  ;;  %v320_v62 = vld [vmem:[#allocation7 + $0x48] sm:$0xff]  ;;  %v322_v63 = vld [vmem:[#allocation7 + $0x58] sm:$0xff]  ;;  %v319_v2 = vld [vmem:[#allocation7 + $0x40] sm:$0xff] }
  0x7c   :  { %2039 = vmatprep.subr.bf16.mxu1 %v2038_v52  ;;  %v2046_v1 = vpack.c.bf16 %v322_v63, %v320_v62  ;;  %v321_v3 = vld [vmem:[#allocation7 + $0x50] sm:$0xff]  ;;  %v324_v5 = vld [vmem:[#allocation7 + $0x68] sm:$0xff]  ;;  %v326_v6 = vld [vmem:[#allocation7 + $0x78] sm:$0xff] }
  0x7d   :  { %2021 = vmatpush1.bf16.msra.mxu0 %v2020_v26  ;;  %2041 = vmatpush1.bf16.msra.mxu1 %v2040_v55  ;;  %v2048_v4 = vpack.c.bf16 %v321_v3, %v319_v2  ;;  %v2050_v7 = vpack.c.bf16 %v326_v6, %v324_v5  ;;  %v323_v8 = vld [vmem:[#allocation7 + $0x60] sm:$0xff]  ;;  %v325_v9 = vld [vmem:[#allocation7 + $0x70] sm:$0xff]  ;;  %v328_v11 = vld [vmem:[#allocation7 + $0x88] sm:$0xff] }
  0x7e   :  { %2023 = vmatprep.subr.bf16.mxu0 %v2022_v27  ;;  %2043 = vmatprep.subr.bf16.mxu1 %v2042_v58  ;;  %v2052_v10 = vpack.c.bf16 %v325_v9, %v323_v8  ;;  %v330_v12 = vld [vmem:[#allocation7 + $0x98] sm:$0xff]  ;;  %v327_v14 = vld [vmem:[#allocation7 + $0x80] sm:$0xff]  ;;  %v329_v15 = vld [vmem:[#allocation7 + $0x90] sm:$0xff] }
  0x7f   :  { %v2054_v13 = vpack.c.bf16 %v330_v12, %v328_v11  ;;  %v2056_v16 = vpack.c.bf16 %v329_v15, %v327_v14  ;;  %v332_v17 = vld [vmem:[#allocation7 + $0xa8] sm:$0xff]  ;;  %v334_v18 = vld [vmem:[#allocation7 + $0xb8] sm:$0xff]  ;;  %v331_v20 = vld [vmem:[#allocation7 + $0xa0] sm:$0xff] }
  0x80   :  { %v2058_v19 = vpack.c.bf16 %v334_v18, %v332_v17  ;;  %v333_v21 = vld [vmem:[#allocation7 + $0xb0] sm:$0xff]  ;;  %v336_v23 = vld [vmem:[#allocation7 + $0xc8] sm:$0xff]  ;;  %v338_v24 = vld [vmem:[#allocation7 + $0xd8] sm:$0xff] }
  0x81   :  { %2025 = vmatpush1.bf16.msra.mxu0 %v2024_v32  ;;  %2045 = vmatpush1.bf16.msra.mxu1 %v2044_v61  ;;  %v2060_v22 = vpack.c.bf16 %v333_v21, %v331_v20  ;;  %v2062_v25 = vpack.c.bf16 %v338_v24, %v336_v23  ;;  %v335_v26 = vld [vmem:[#allocation7 + $0xc0] sm:$0xff]  ;;  %v337_v27 = vld [vmem:[#allocation7 + $0xd0] sm:$0xff]  ;;  %v340_v29 = vld [vmem:[#allocation7 + $0xe8] sm:$0xff]  ;;  %v105_v20 = vlaneseq }
  0x82   :  { %2027 = vmatprep.subr.bf16.mxu0 %v2026_v33  ;;  %2047 = vmatprep.subr.bf16.mxu1 %v2046_v1  ;;  %v2064_v28 = vpack.c.bf16 %v337_v27, %v335_v26  ;;  %v342_v30 = vld [vmem:[#allocation7 + $0xf8] sm:$0xff]  ;;  %v339_v32 = vld [vmem:[#allocation7 + $0xe0] sm:$0xff]  ;;  %v341_v33 = vld [vmem:[#allocation7 + $0xf0] sm:$0xff] }
  0x83   :  { %v2066_v31 = vpack.c.bf16 %v342_v30, %v340_v29  ;;  %v2068_v34 = vpack.c.bf16 %v341_v33, %v339_v32  ;;  %v344_v35 = vld [vmem:[#allocation7 + $0x108] sm:$0xff]  ;;  %v346_v36 = vld [vmem:[#allocation7 + $0x118] sm:$0xff]  ;;  %v351_v50 = vld [vmem:[#allocation7 + $0x140] sm:$0xff]  ;;  %v106_v21 = vshrl.u32 %v105_v20, 7 }
  0x84   :  { %v2070_v37 = vpack.c.bf16 %v346_v36, %v344_v35  ;;  %v348_v41 = vld [vmem:[#allocation7 + $0x128] sm:$0xff]  ;;  %v350_v42 = vld [vmem:[#allocation7 + $0x138] sm:$0xff]  ;;  %v353_v51 = vld [vmem:[#allocation7 + $0x150] sm:$0xff] }
  0x85   :  { %2029 = vmatpush1.bf16.msra.mxu0 %v2028_v38  ;;  %2049 = vmatpush1.bf16.msra.mxu1 %v2048_v4  ;;  %v343_v38 = vld [vmem:[#allocation7 + $0x100] sm:$0xff]  ;;  %v2074_v43 = vpack.c.bf16 %v350_v42, %v348_v41  ;;  %v352_v47 = vld [vmem:[#allocation7 + $0x148] sm:$0xff]  ;;  %v2080_v52 = vpack.c.bf16 %v353_v51, %v351_v50  ;;  %v358_v54 = vld [vmem:[#allocation7 + $0x178] sm:$0xff]  ;;  %v2782_v24 = vsub.s32 1, %v106_v21  ;;  %vm107_vm0 = vcmp.lt.s32.totalorder %v106_v21, 2 }
  0x86   :  { %2031 = vmatprep.subr.bf16.mxu0 %v2030_v39  ;;  %2051 = vmatprep.subr.bf16.mxu1 %v2050_v7  ;;  %v345_v39 = vld [vmem:[#allocation7 + $0x110] sm:$0xff]  ;;  %v356_v53 = vld [vmem:[#allocation7 + $0x168] sm:$0xff]  ;;  %v355_v55 = vld [vmem:[#allocation7 + $0x160] sm:$0xff]  ;;  %v2787_v27 = vsel %vm107_vm0, 1.0, %v2658_v0 }
  0x87   :  { %v2072_v40 = vpack.c.bf16 %v345_v39, %v343_v38  ;;  %v2082_v56 = vpack.c.bf16 %v358_v54, %v356_v53  ;;  %v357_v57 = vld [vmem:[#allocation7 + $0x170] sm:$0xff]  ;;  %v360_v58 = vld [vmem:[#allocation7 + $0x188] sm:$0xff]  ;;  %v362_v59 = vld [vmem:[#allocation7 + $0x198] sm:$0xff] }
  0x88   :  { %v2084_v60 = vpack.c.bf16 %v357_v57, %v355_v55  ;;  %v2086_v61 = vpack.c.bf16 %v362_v59, %v360_v58  ;;  %v359_v62 = vld [vmem:[#allocation7 + $0x180] sm:$0xff]  ;;  %v361_v63 = vld [vmem:[#allocation7 + $0x190] sm:$0xff]  ;;  %v364_v1 = vld [vmem:[#allocation7 + $0x1a8] sm:$0xff] }
  0x89   :  { %2033 = vmatpush1.bf16.msra.mxu0 %v2032_v44  ;;  %2053 = vmatpush1.bf16.msra.mxu1 %v2052_v10  ;;  %v347_v44 = vld [vmem:[#allocation7 + $0x120] sm:$0xff]  ;;  %v366_v2 = vld [vmem:[#allocation7 + $0x1b8] sm:$0xff]  ;;  %v2088_v3 = vpack.c.bf16 %v361_v63, %v359_v62  ;;  %v365_v6 = vld [vmem:[#allocation7 + $0x1b0] sm:$0xff] }
  0x8a   :  { %2035 = vmatprep.subr.bf16.mxu0 %v2034_v45  ;;  %2055 = vmatprep.subr.bf16.mxu1 %v2054_v13  ;;  %v349_v45 = vld [vmem:[#allocation7 + $0x130] sm:$0xff]  ;;  %v2090_v4 = vpack.c.bf16 %v366_v2, %v364_v1  ;;  %v363_v5 = vld [vmem:[#allocation7 + $0x1a0] sm:$0xff]  ;;  %v368_v7 = vld [vmem:[#allocation7 + $0x1c8] sm:$0xff] }
  0x8b   :  { %v2076_v46 = vpack.c.bf16 %v349_v45, %v347_v44  ;;  %v370_v8 = vld [vmem:[#allocation7 + $0x1d8] sm:$0xff]  ;;  %v2092_v9 = vpack.c.bf16 %v365_v6, %v363_v5  ;;  %v367_v11 = vld [vmem:[#allocation7 + $0x1c0] sm:$0xff]  ;;  %v369_v12 = vld [vmem:[#allocation7 + $0x1d0] sm:$0xff] }
  0x8c   :  { %v2094_v10 = vpack.c.bf16 %v370_v8, %v368_v7  ;;  %v372_v13 = vld [vmem:[#allocation7 + $0x1e8] sm:$0xff]  ;;  %v374_v14 = vld [vmem:[#allocation7 + $0x1f8] sm:$0xff]  ;;  %v2096_v15 = vpack.c.bf16 %v369_v12, %v367_v11  ;;  %v371_v17 = vld [vmem:[#allocation7 + $0x1e0] sm:$0xff] }
  0x8d   :  { %2037 = vmatpush1.bf16.msra.mxu0 %v2036_v48  ;;  %2057 = vmatpush1.bf16.msra.mxu1 %v2056_v16  ;;  %v354_v48 = vld [vmem:[#allocation7 + $0x158] sm:$0xff]  ;;  %v2098_v16 = vpack.c.bf16 %v374_v14, %v372_v13  ;;  %v373_v18 = vld [vmem:[#allocation7 + $0x1f0] sm:$0xff]  ;;  %v146_v23 = vld [vmem:[#allocation8] ss:$8 sm:$0x3] }
  0x8e   :  { %2059 = vmatprep.subr.bf16.mxu1 %v2058_v19  ;;  %v2100_v19 = vpack.c.bf16 %v373_v18, %v371_v17  ;;  %v155_v26 = vrot.slane %v146_v23, %v2782_v24  ;;  %v230_v7 = vld [vmem:[#allocation8 + $0x10] ss:$8 sm:$0x3]  ;;  %v232_v8 = vld [vmem:[#allocation8 + $0x20] ss:$8 sm:$0x3] }
  0x8f   :  { %v283_v11 = vrot.slane %v230_v7, %v2782_v24 }
  0x90   :  { %223 = vmatmul.mubr.f32.vlgmr.msra.gmra.mrb[0].mxu0 %v104_v49  ;;  %v2078_v49 = vpack.c.bf16 %v354_v48, %v352_v47 }
  0x91   :  { %2061 = vmatpush1.bf16.msra.mxu1 %v2060_v22  ;;  %v2780_v22 = vsub.s32 0, %v106_v21 }
  0x92   :  { %2063 = vmatprep.subr.bf16.mxu1 %v2062_v25 }
  0x93   :  { %v151_v25 = vrot.slane %v146_v23, %v2780_v22  ;;  %v292_v14 = vrot.slane %v232_v8, %v2780_v22 }
  0x95   :  { %2065 = vmatpush1.bf16.msra.mxu1 %v2064_v28 }
  0x96   :  { %2067 = vmatprep.subr.bf16.mxu1 %v2066_v31 }
  0x99   :  { %2069 = vmatpush1.bf16.msra.mxu1 %v2068_v34 }
  0x9a   :  { %2071 = vmatprep.subr.bf16.mxu1 %v2070_v37 }
  0x9d   :  { %2073 = vmatpush1.bf16.msra.mxu1 %v2072_v40 }
  0x9e   :  { %2075 = vmatprep.subr.bf16.mxu1 %v2074_v43 }
  0xa1   :  { %2077 = vmatpush1.bf16.msra.mxu1 %v2076_v46 }
  0xa2   :  { %2079 = vmatprep.subr.bf16.mxu1 %v2078_v49 }
  0xa5   :  { %2081 = vmatpush1.bf16.msra.mxu1 %v2080_v52 }
  0xa6   :  { %2083 = vmatprep.subr.bf16.mxu1 %v2082_v56 }
  0xa9   :  { %2085 = vmatpush1.bf16.msra.mxu1 %v2084_v60 }
  0xaa   :  { %2087 = vmatprep.subr.bf16.mxu1 %v2086_v61 }
  0xad   :  { %2089 = vmatpush1.bf16.msra.mxu1 %v2088_v3 }
  0xae   :  { %2091 = vmatprep.subr.bf16.mxu1 %v2090_v4 }
  0xb1   :  { %2093 = vmatpush1.bf16.msra.mxu1 %v2092_v9  ;;  %v279_v9 = vrot.slane %v230_v7, %v2780_v22 }
  0xb2   :  { %2095 = vmatprep.subr.bf16.mxu1 %v2094_v10 }
  0xb5   :  { %2097 = vmatpush1.bf16.msra.mxu1 %v2096_v15 }
  0xb6   :  { %2099 = vmatprep.subr.bf16.mxu1 %v2098_v16  ;;  %v296_v16 = vrot.slane %v232_v8, %v2782_v24  ;;  %v567_v8 = vld [vmem:[#allocation7 + $0x2c8] sm:$0xff] }
  0xb9   :  { %2101 = vmatpush1.bf16.msra.mxu1 %v2100_v19 }
 0x163   :  { %v224_v28 = vpop.f32.mrb[0].mxu0 }
 0x164   :  { %v225_v29 = vadd.f32 %v224_v28, %v151_v25  ;;  %v226_v30 = vpop.f32.mrb[1].mxu0 }
 0x165   :  { %v227_v31 = vadd.f32 %v226_v30, %v155_v26 }
 0x166   :  { %v233_v32 = vmul.f32 %v2787_v27, %v225_v29 }
 0x167   :  { %v234_v33 = vmul.f32 %v2787_v27, %v227_v31 }
 0x168   :  { %v235_v34 = vrot.slane %v233_v32, 4 }
 0x169   :  { %v241_v35 = vrot.slane %v234_v33, 4 }
 0x16a   :  { %v236_v36 = vadd.f32 %v235_v34, %v233_v32 }
 0x16b   :  { %v242_v37 = vadd.f32 %v241_v35, %v234_v33  ;;  %v543_v35 = vld [vmem:[#allocation7 + $0x208] sm:$0xff] }
 0x16c   :  { %v237_v38 = vrot.slane %v236_v36, 2 }
 0x16d   :  { %v243_v39 = vrot.slane %v242_v37, 2 }
 0x16e   :  { %v238_v40 = vadd.f32 %v237_v38, %v236_v36  ;;  %v545_v36 = vld [vmem:[#allocation7 + $0x218] sm:$0xff]  ;;  %v542_v38 = vld [vmem:[#allocation7 + $0x200] sm:$0xff] }
 0x16f   :  { %v244_v41 = vadd.f32 %v243_v39, %v242_v37  ;;  %v2102_v37 = vpack.c.bf16 %v545_v36, %v543_v35  ;;  %v544_v39 = vld [vmem:[#allocation7 + $0x210] sm:$0xff]  ;;  %v583_v36 = vld [vmem:[#allocation7 + $0x348] sm:$0xff] }
 0x170   :  { %v239_v42 = vrot.slane %v238_v40, 1 }
 0x171   :  { %v245_v43 = vrot.slane %v244_v41, 1  ;;  %2103 = vmatprep.subr.bf16.mxu0 %v2102_v37  ;;  %v585_v37 = vld [vmem:[#allocation7 + $0x358] sm:$0xff] }
 0x172   :  { %v240_v44 = vadd.f32 %v239_v42, %v238_v40  ;;  %v2104_v40 = vpack.c.bf16 %v544_v39, %v542_v38  ;;  %v549_v42 = vld [vmem:[#allocation7 + $0x238] sm:$0xff]  ;;  %v2142_v38 = vpack.c.bf16 %v585_v37, %v583_v36  ;;  %v582_v39 = vld [vmem:[#allocation7 + $0x340] sm:$0xff] }
 0x173   :  { %v246_v45 = vadd.f32 %v245_v43, %v244_v41  ;;  %v547_v41 = vld [vmem:[#allocation7 + $0x228] sm:$0xff] }
 0x174   :  { %v247_v46 = vmul.f32 0.5, %v240_v44  ;;  %2105 = vmatpush1.bf16.msra.mxu0 %v2104_v40  ;;  %v2106_v43 = vpack.c.bf16 %v549_v42, %v547_v41  ;;  %v546_v44 = vld [vmem:[#allocation7 + $0x220] sm:$0xff]  ;;  %v584_v40 = vld [vmem:[#allocation7 + $0x350] sm:$0xff]  ;;  %v587_v42 = vld [vmem:[#allocation7 + $0x368] sm:$0xff] }
 0x175   :  { %v248_v47 = vmul.f32 0.5, %v246_v45  ;;  %v548_v45 = vld [vmem:[#allocation7 + $0x230] sm:$0xff]  ;;  %v2144_v41 = vpack.c.bf16 %v584_v40, %v582_v39 }
 0x176   :  { %v249_v48 = vsub.f32 %v225_v29, %v247_v46  ;;  %v2108_v46 = vpack.c.bf16 %v548_v45, %v546_v44  ;;  %2107 = vmatprep.subr.bf16.mxu0 %v2106_v43  ;;  %v589_v43 = vld [vmem:[#allocation7 + $0x378] sm:$0xff]  ;;  %v586_v45 = vld [vmem:[#allocation7 + $0x360] sm:$0xff] }
 0x177   :  { %v250_v49 = vsub.f32 %v227_v31, %v248_v47  ;;  %v551_v47 = vld [vmem:[#allocation7 + $0x248] sm:$0xff]  ;;  %v2146_v44 = vpack.c.bf16 %v589_v43, %v587_v42 }
 0x178   :  { %v251_v50 = vmul.f32 %v2787_v27, %v249_v48  ;;  %2109 = vmatpush1.bf16.msra.mxu0 %v2108_v46  ;;  %v588_v46 = vld [vmem:[#allocation7 + $0x370] sm:$0xff] }
 0x179   :  { %v252_v51 = vmul.f32 %v2787_v27, %v250_v49 }
 0x17a   :  { %v253_v52 = vmul.f32 %v251_v50, %v251_v50  ;;  %v550_v50 = vld [vmem:[#allocation7 + $0x240] sm:$0xff] }
 0x17b   :  { %v254_v53 = vmul.f32 %v252_v51, %v252_v51  ;;  %v552_v51 = vld [vmem:[#allocation7 + $0x250] sm:$0xff] }
 0x17c   :  { %v255_v54 = vrot.slane %v253_v52, 4 }
 0x17d   :  { %v261_v55 = vrot.slane %v254_v53, 4 }
 0x17e   :  { %v256_v56 = vadd.f32 %v255_v54, %v253_v52  ;;  %v2112_v52 = vpack.c.bf16 %v552_v51, %v550_v50  ;;  %v557_v54 = vld [vmem:[#allocation7 + $0x278] sm:$0xff]  ;;  %v590_v51 = vld [vmem:[#allocation7 + $0x380] sm:$0xff] }
 0x17f   :  { %v262_v57 = vadd.f32 %v261_v55, %v254_v53  ;;  %v555_v53 = vld [vmem:[#allocation7 + $0x268] sm:$0xff] }
 0x180   :  { %v257_v58 = vrot.slane %v256_v56, 2  ;;  %v2114_v55 = vpack.c.bf16 %v557_v54, %v555_v53  ;;  %v595_v54 = vld [vmem:[#allocation7 + $0x3a8] sm:$0xff] }
 0x181   :  { %v263_v59 = vrot.slane %v262_v57, 2 }
 0x182   :  { %v258_v60 = vadd.f32 %v257_v58, %v256_v56  ;;  %v554_v56 = vld [vmem:[#allocation7 + $0x260] sm:$0xff] }
 0x183   :  { %v264_v61 = vadd.f32 %v263_v59, %v262_v57  ;;  %v556_v57 = vld [vmem:[#allocation7 + $0x270] sm:$0xff]  ;;  %v559_v59 = vld [vmem:[#allocation7 + $0x288] sm:$0xff] }
 0x184   :  { %v259_v62 = vrot.slane %v258_v60, 1  ;;  %v2116_v58 = vpack.c.bf16 %v556_v57, %v554_v56  ;;  %v594_v56 = vld [vmem:[#allocation7 + $0x3a0] sm:$0xff] }
 0x185   :  { %v265_v63 = vrot.slane %v264_v61, 1 }
 0x186   :  { %v260_v1 = vadd.f32 %v259_v62, %v258_v60  ;;  %v561_v60 = vld [vmem:[#allocation7 + $0x298] sm:$0xff]  ;;  %v558_v62 = vld [vmem:[#allocation7 + $0x280] sm:$0xff] }
 0x187   :  { %v266_v2 = vadd.f32 %v265_v63, %v264_v61  ;;  %v2118_v61 = vpack.c.bf16 %v561_v60, %v559_v59  ;;  %v560_v63 = vld [vmem:[#allocation7 + $0x290] sm:$0xff]  ;;  %v599_v59 = vld [vmem:[#allocation7 + $0x3c8] sm:$0xff]  ;;  %v601_v60 = vld [vmem:[#allocation7 + $0x3d8] sm:$0xff] }
 0x188   :  { %v267_v3 = vmul.f32 0.5, %v260_v1  ;;  %v2120_v1 = vpack.c.bf16 %v560_v63, %v558_v62  ;;  %v2158_v62 = vpack.c.bf16 %v601_v60, %v599_v59  ;;  %v598_v63 = vld [vmem:[#allocation7 + $0x3c0] sm:$0xff] }
 0x189   :  { %v268_v4 = vmul.f32 0.5, %v266_v2  ;;  %v563_v2 = vld [vmem:[#allocation7 + $0x2a8] sm:$0xff] }
 0x18a   :  { %v269_v5 = vadd.f32 1e-05, %v267_v3  ;;  %v565_v3 = vld [vmem:[#allocation7 + $0x2b8] sm:$0xff]  ;;  %v462_v59 = vld [vmem:[#allocation8 + $0x21] ss:$8 sm:$0x3] }
 0x18b   :  { %v270_v6 = vadd.f32 1e-05, %v268_v4  ;;  %v2122_v4 = vpack.c.bf16 %v565_v3, %v563_v2  ;;  %v603_v2 = vld [vmem:[#allocation7 + $0x3e8] sm:$0xff]  ;;  %v605_v3 = vld [vmem:[#allocation7 + $0x3f8] sm:$0xff] }
 0x18c   :  { %2428 = vrsqrt.f32 %v269_v5  ;;  %v562_v5 = vld [vmem:[#allocation7 + $0x2a0] sm:$0xff] }
 0x18d   :  { %2430 = vrsqrt.f32 %v270_v6  ;;  %v564_v6 = vld [vmem:[#allocation7 + $0x2b0] sm:$0xff] }
 0x18e   :  { %v2124_v7 = vpack.c.bf16 %v564_v6, %v562_v5  ;;  %v2162_v5 = vpack.c.bf16 %v605_v3, %v603_v2  ;;  %v602_v6 = vld [vmem:[#allocation7 + $0x3e0] sm:$0xff]  ;;  %v522_v2 = vrot.slane %v462_v59, %v2780_v22 }
 0x196   :  { %v2429_v10 = vpop.eup %2428 }
 0x197   :  { %v2431_v12 = vpop.eup %2430  ;;  %v273_v13 = vmul.f32 %v2429_v10, %v249_v48  ;;  %v553_v48 = vld [vmem:[#allocation7 + $0x258] sm:$0xff] }
 0x198   :  { %v274_v15 = vmul.f32 %v2431_v12, %v250_v49  ;;  %v2110_v49 = vpack.c.bf16 %v553_v48, %v551_v47  ;;  %v568_v12 = vld [vmem:[#allocation7 + $0x2d0] sm:$0xff]  ;;  %v2148_v47 = vpack.c.bf16 %v588_v46, %v586_v45  ;;  %v591_v48 = vld [vmem:[#allocation7 + $0x388] sm:$0xff] }
 0x199   :  { %v286_v17 = vmul.f32 %v279_v9, %v273_v13  ;;  %v569_v9 = vld [vmem:[#allocation7 + $0x2d8] sm:$0xff] }
 0x19a   :  { %v287_v18 = vmul.f32 %v283_v11, %v274_v15  ;;  %2111 = vmatprep.subr.bf16.mxu0 %v2110_v49  ;;  %v2126_v10 = vpack.c.bf16 %v569_v9, %v567_v8  ;;  %v566_v11 = vld [vmem:[#allocation7 + $0x2c0] sm:$0xff]  ;;  %v573_v15 = vld [vmem:[#allocation7 + $0x2f8] sm:$0xff] }
 0x19b   :  { %v299_v19 = vadd.f32 %v292_v14, %v286_v17  ;;  %2113 = vmatpush1.bf16.msra.mxu0 %v2112_v52  ;;  %v2128_v13 = vpack.c.bf16 %v568_v12, %v566_v11  ;;  %v571_v14 = vld [vmem:[#allocation7 + $0x2e8] sm:$0xff]  ;;  %v570_v17 = vld [vmem:[#allocation7 + $0x2e0] sm:$0xff]  ;;  %v593_v49 = vld [vmem:[#allocation7 + $0x398] sm:$0xff] }
 0x19c   :  { %v300_v21 = vadd.f32 %v296_v16, %v287_v18  ;;  %2115 = vmatprep.subr.bf16.mxu0 %v2114_v55  ;;  %v2130_v16 = vpack.c.bf16 %v573_v15, %v571_v14  ;;  %v572_v18 = vld [vmem:[#allocation7 + $0x2f0] sm:$0xff]  ;;  %v2150_v50 = vpack.c.bf16 %v593_v49, %v591_v48  ;;  %v597_v55 = vld [vmem:[#allocation7 + $0x3b8] sm:$0xff]  ;;  %v376_v9 = vld [vmem:[#allocation8 + $0x1] ss:$8 sm:$0x3] }
 0x19d   :  { %v303_v23 = vmul.f32 0.70710677, %v299_v19  ;;  %v301_v32 = vmul.f32 0.5, %v299_v19  ;;  %v2132_v19 = vpack.c.bf16 %v572_v18, %v570_v17  ;;  %v592_v52 = vld [vmem:[#allocation7 + $0x390] sm:$0xff]  ;;  %v2154_v57 = vpack.c.bf16 %v597_v55, %v595_v54 }
 0x19e   :  { %v304_v25 = vmul.f32 0.70710677, %v300_v21  ;;  %v302_v30 = vmul.f32 0.5, %v300_v21  ;;  %v575_v21 = vld [vmem:[#allocation7 + $0x308] sm:$0xff]  ;;  %v2152_v53 = vpack.c.bf16 %v592_v52, %v590_v51  ;;  %v385_v11 = vrot.slane %v376_v9, %v2782_v24 }
 0x19f   :  { %2432 = verf.f32 %v303_v23  ;;  %2117 = vmatpush1.bf16.msra.mxu0 %v2116_v58  ;;  %v577_v23 = vld [vmem:[#allocation7 + $0x318] sm:$0xff]  ;;  %v596_v58 = vld [vmem:[#allocation7 + $0x3b0] sm:$0xff] }
 0x1a0   :  { %2434 = verf.f32 %v304_v25  ;;  %2119 = vmatprep.subr.bf16.mxu0 %v2118_v61  ;;  %v2134_v25 = vpack.c.bf16 %v577_v23, %v575_v21  ;;  %v2156_v61 = vpack.c.bf16 %v596_v58, %v594_v56  ;;  %v460_v58 = vld [vmem:[#allocation8 + $0x11] ss:$8 sm:$0x3] }
 0x1a1   :  { %v509_v60 = vrot.slane %v460_v58, %v2780_v22 }
 0x1a3   :  { %2121 = vmatpush1.bf16.msra.mxu0 %v2120_v1  ;;  %v600_v1 = vld [vmem:[#allocation7 + $0x3d0] sm:$0xff] }
 0x1a4   :  { %2123 = vmatprep.subr.bf16.mxu0 %v2122_v4  ;;  %v2160_v4 = vpack.c.bf16 %v600_v1, %v598_v63 }
 0x1a7   :  { %2125 = vmatpush1.bf16.msra.mxu0 %v2124_v7  ;;  %v604_v7 = vld [vmem:[#allocation7 + $0x3f0] sm:$0xff] }
 0x1a8   :  { %2127 = vmatprep.subr.bf16.mxu0 %v2126_v10  ;;  %v2164_v8 = vpack.c.bf16 %v604_v7, %v602_v6  ;;  %v381_v10 = vrot.slane %v376_v9, %v2780_v22 }
 0x1a9   :  { %v2433_v26 = vpop.eup %2432 }
 0x1aa   :  { %v2435_v28 = vpop.eup %2434  ;;  %v307_v29 = vadd.f32 1.0, %v2433_v26  ;;  %v574_v26 = vld [vmem:[#allocation7 + $0x300] sm:$0xff] }
 0x1ab   :  { %v308_v31 = vadd.f32 1.0, %v2435_v28  ;;  %2129 = vmatpush1.bf16.msra.mxu0 %v2128_v13  ;;  %v576_v28 = vld [vmem:[#allocation7 + $0x310] sm:$0xff] }
 0x1ac   :  { %v309_v34 = vmul.f32 %v307_v29, %v301_v32  ;;  %2131 = vmatprep.subr.bf16.mxu0 %v2130_v16  ;;  %v2136_v29 = vpack.c.bf16 %v576_v28, %v574_v26 }
 0x1ad   :  { %v310_v33 = vmul.f32 %v308_v31, %v302_v30  ;;  %v579_v30 = vld [vmem:[#allocation7 + $0x328] sm:$0xff]  ;;  %v581_v31 = vld [vmem:[#allocation7 + $0x338] sm:$0xff] }
 0x1ae   :  { %v2138_v32 = vpack.c.bf16 %v581_v31, %v579_v30 }
 0x1af   :  { %452 = vmatprep.mubr.f32.mxu1 %v310_v33  ;;  %2133 = vmatpush1.bf16.msra.mxu0 %v2132_v19  ;;  %v578_v33 = vld [vmem:[#allocation7 + $0x320] sm:$0xff] }
 0x1b0   :  { %453 = vmatmul.mubr.f32.vlgmr.msra.gmra.mrb[0].mxu1 %v309_v34  ;;  %2135 = vmatprep.subr.bf16.mxu0 %v2134_v25  ;;  %v580_v34 = vld [vmem:[#allocation7 + $0x330] sm:$0xff] }
 0x1b1   :  { %v2140_v35 = vpack.c.bf16 %v580_v34, %v578_v33 }
 0x1b3   :  { %2137 = vmatpush1.bf16.msra.mxu0 %v2136_v29 }
 0x1b4   :  { %2139 = vmatprep.subr.bf16.mxu0 %v2138_v32 }
 0x1b7   :  { %2141 = vmatpush1.bf16.msra.mxu0 %v2140_v35 }
 0x1b8   :  { %2143 = vmatprep.subr.bf16.mxu0 %v2142_v38 }
 0x1bb   :  { %2145 = vmatpush1.bf16.msra.mxu0 %v2144_v41 }
 0x1bc   :  { %2147 = vmatprep.subr.bf16.mxu0 %v2146_v44 }
 0x1bf   :  { %2149 = vmatpush1.bf16.msra.mxu0 %v2148_v47 }
 0x1c0   :  { %2151 = vmatprep.subr.bf16.mxu0 %v2150_v50 }
 0x1c3   :  { %2153 = vmatpush1.bf16.msra.mxu0 %v2152_v53 }
 0x1c4   :  { %2155 = vmatprep.subr.bf16.mxu0 %v2154_v57 }
 0x1c7   :  { %2157 = vmatpush1.bf16.msra.mxu0 %v2156_v61 }
 0x1c8   :  { %2159 = vmatprep.subr.bf16.mxu0 %v2158_v62  ;;  %v513_v62 = vrot.slane %v460_v58, %v2782_v24 }
 0x1cb   :  { %2161 = vmatpush1.bf16.msra.mxu0 %v2160_v4  ;;  %v526_v4 = vrot.slane %v462_v59, %v2782_v24  ;;  %v798_v59 = vld [vmem:[#allocation7 + $0x4c8] sm:$0xff] }
 0x1cc   :  { %2163 = vmatprep.subr.bf16.mxu0 %v2162_v5 }
 0x1cf   :  { %2165 = vmatpush1.bf16.msra.mxu0 %v2164_v8 }
 0x283   :  { %v454_v12 = vpop.f32.mrb[0].mxu1 }
 0x284   :  { %v455_v13 = vadd.f32 %v454_v12, %v381_v10  ;;  %v456_v14 = vpop.f32.mrb[1].mxu1 }
 0x285   :  { %v457_v15 = vadd.f32 %v456_v14, %v385_v11 }
 0x286   :  { %v463_v16 = vmul.f32 %v2787_v27, %v455_v13 }
 0x287   :  { %v464_v17 = vmul.f32 %v2787_v27, %v457_v15 }
 0x288   :  { %v465_v18 = vrot.slane %v463_v16, 4 }
 0x289   :  { %v471_v19 = vrot.slane %v464_v17, 4 }
 0x28a   :  { %v466_v21 = vadd.f32 %v465_v18, %v463_v16 }
 0x28b   :  { %v472_v23 = vadd.f32 %v471_v19, %v464_v17  ;;  %v774_v19 = vld [vmem:[#allocation7 + $0x408] sm:$0xff] }
 0x28c   :  { %v467_v25 = vrot.slane %v466_v21, 2 }
 0x28d   :  { %v473_v26 = vrot.slane %v472_v23, 2 }
 0x28e   :  { %v468_v28 = vadd.f32 %v467_v25, %v466_v21  ;;  %v776_v21 = vld [vmem:[#allocation7 + $0x418] sm:$0xff]  ;;  %v773_v25 = vld [vmem:[#allocation7 + $0x400] sm:$0xff] }
 0x28f   :  { %v474_v29 = vadd.f32 %v473_v26, %v472_v23  ;;  %v2166_v23 = vpack.c.bf16 %v776_v21, %v774_v19  ;;  %v775_v26 = vld [vmem:[#allocation7 + $0x410] sm:$0xff]  ;;  %v814_v21 = vld [vmem:[#allocation7 + $0x548] sm:$0xff] }
 0x290   :  { %v469_v30 = vrot.slane %v468_v28, 1 }
 0x291   :  { %v475_v31 = vrot.slane %v474_v29, 1  ;;  %2167 = vmatprep.subr.bf16.mxu1 %v2166_v23  ;;  %v816_v23 = vld [vmem:[#allocation7 + $0x558] sm:$0xff] }
 0x292   :  { %v470_v32 = vadd.f32 %v469_v30, %v468_v28  ;;  %v2168_v28 = vpack.c.bf16 %v775_v26, %v773_v25  ;;  %v780_v30 = vld [vmem:[#allocation7 + $0x438] sm:$0xff]  ;;  %v2206_v25 = vpack.c.bf16 %v816_v23, %v814_v21  ;;  %v813_v26 = vld [vmem:[#allocation7 + $0x540] sm:$0xff]  ;;  %v949_v21 = vld [vmem:[#allocation7 + $0x688] sm:$0xff] }
 0x293   :  { %v476_v33 = vadd.f32 %v475_v31, %v474_v29  ;;  %v778_v29 = vld [vmem:[#allocation7 + $0x428] sm:$0xff]  ;;  %v951_v23 = vld [vmem:[#allocation7 + $0x698] sm:$0xff] }
 0x294   :  { %v477_v34 = vmul.f32 0.5, %v470_v32  ;;  %2169 = vmatpush1.bf16.msra.mxu1 %v2168_v28  ;;  %v2170_v31 = vpack.c.bf16 %v780_v30, %v778_v29  ;;  %v777_v32 = vld [vmem:[#allocation7 + $0x420] sm:$0xff]  ;;  %v815_v28 = vld [vmem:[#allocation7 + $0x550] sm:$0xff]  ;;  %v818_v30 = vld [vmem:[#allocation7 + $0x568] sm:$0xff] }
 0x295   :  { %v478_v35 = vmul.f32 0.5, %v476_v33  ;;  %v779_v33 = vld [vmem:[#allocation7 + $0x430] sm:$0xff]  ;;  %v2208_v29 = vpack.c.bf16 %v815_v28, %v813_v26  ;;  %v2246_v26 = vpack.c.bf16 %v951_v23, %v949_v21  ;;  %v948_v28 = vld [vmem:[#allocation7 + $0x680] sm:$0xff] }
 0x296   :  { %v479_v36 = vsub.f32 %v455_v13, %v477_v34  ;;  %v2172_v34 = vpack.c.bf16 %v779_v33, %v777_v32  ;;  %2171 = vmatprep.subr.bf16.mxu1 %v2170_v31  ;;  %v820_v31 = vld [vmem:[#allocation7 + $0x578] sm:$0xff]  ;;  %v817_v33 = vld [vmem:[#allocation7 + $0x560] sm:$0xff] }
 0x297   :  { %v480_v37 = vsub.f32 %v457_v15, %v478_v35  ;;  %v782_v35 = vld [vmem:[#allocation7 + $0x448] sm:$0xff]  ;;  %v2210_v32 = vpack.c.bf16 %v820_v31, %v818_v30  ;;  %v955_v31 = vld [vmem:[#allocation7 + $0x6b8] sm:$0xff] }
 0x298   :  { %v481_v38 = vmul.f32 %v2787_v27, %v479_v36  ;;  %2173 = vmatpush1.bf16.msra.mxu1 %v2172_v34  ;;  %v819_v34 = vld [vmem:[#allocation7 + $0x570] sm:$0xff]  ;;  %v953_v30 = vld [vmem:[#allocation7 + $0x6a8] sm:$0xff] }
 0x299   :  { %v482_v39 = vmul.f32 %v2787_v27, %v480_v37 }
 0x29a   :  { %v483_v40 = vmul.f32 %v481_v38, %v481_v38  ;;  %v781_v38 = vld [vmem:[#allocation7 + $0x440] sm:$0xff] }
 0x29b   :  { %v484_v41 = vmul.f32 %v482_v39, %v482_v39  ;;  %v783_v39 = vld [vmem:[#allocation7 + $0x450] sm:$0xff] }
 0x29c   :  { %v485_v42 = vrot.slane %v483_v40, 4 }
 0x29d   :  { %v491_v43 = vrot.slane %v484_v41, 4 }
 0x29e   :  { %v486_v44 = vadd.f32 %v485_v42, %v483_v40  ;;  %v2176_v40 = vpack.c.bf16 %v783_v39, %v781_v38  ;;  %v788_v42 = vld [vmem:[#allocation7 + $0x478] sm:$0xff]  ;;  %v821_v39 = vld [vmem:[#allocation7 + $0x580] sm:$0xff] }
 0x29f   :  { %v492_v45 = vadd.f32 %v491_v43, %v484_v41  ;;  %v786_v41 = vld [vmem:[#allocation7 + $0x468] sm:$0xff] }
 0x2a0   :  { %v487_v46 = vrot.slane %v486_v44, 2  ;;  %v2178_v43 = vpack.c.bf16 %v788_v42, %v786_v41  ;;  %v826_v42 = vld [vmem:[#allocation7 + $0x5a8] sm:$0xff] }
 0x2a1   :  { %v493_v47 = vrot.slane %v492_v45, 2 }
 0x2a2   :  { %v488_v48 = vadd.f32 %v487_v46, %v486_v44  ;;  %v785_v44 = vld [vmem:[#allocation7 + $0x460] sm:$0xff] }
 0x2a3   :  { %v494_v49 = vadd.f32 %v493_v47, %v492_v45  ;;  %v787_v45 = vld [vmem:[#allocation7 + $0x470] sm:$0xff]  ;;  %v790_v47 = vld [vmem:[#allocation7 + $0x488] sm:$0xff] }
 0x2a4   :  { %v489_v50 = vrot.slane %v488_v48, 1  ;;  %v2180_v46 = vpack.c.bf16 %v787_v45, %v785_v44  ;;  %v825_v44 = vld [vmem:[#allocation7 + $0x5a0] sm:$0xff] }
 0x2a5   :  { %v495_v51 = vrot.slane %v494_v49, 1 }
 0x2a6   :  { %v490_v52 = vadd.f32 %v489_v50, %v488_v48  ;;  %v792_v48 = vld [vmem:[#allocation7 + $0x498] sm:$0xff]  ;;  %v789_v50 = vld [vmem:[#allocation7 + $0x480] sm:$0xff] }
 0x2a7   :  { %v496_v53 = vadd.f32 %v495_v51, %v494_v49  ;;  %v2182_v49 = vpack.c.bf16 %v792_v48, %v790_v47  ;;  %v791_v51 = vld [vmem:[#allocation7 + $0x490] sm:$0xff]  ;;  %v830_v47 = vld [vmem:[#allocation7 + $0x5c8] sm:$0xff]  ;;  %v832_v48 = vld [vmem:[#allocation7 + $0x5d8] sm:$0xff] }
 0x2a8   :  { %v497_v54 = vmul.f32 0.5, %v490_v52  ;;  %v2184_v52 = vpack.c.bf16 %v791_v51, %v789_v50  ;;  %v2222_v50 = vpack.c.bf16 %v832_v48, %v830_v47  ;;  %v829_v51 = vld [vmem:[#allocation7 + $0x5c0] sm:$0xff]  ;;  %v962_v47 = vld [vmem:[#allocation7 + $0x6f0] sm:$0xff]  ;;  %v965_v48 = vld [vmem:[#allocation7 + $0x708] sm:$0xff] }
 0x2a9   :  { %v498_v55 = vmul.f32 0.5, %v496_v53  ;;  %v794_v53 = vld [vmem:[#allocation7 + $0x4a8] sm:$0xff] }
 0x2aa   :  { %v499_v56 = vadd.f32 1e-05, %v497_v54  ;;  %v796_v54 = vld [vmem:[#allocation7 + $0x4b8] sm:$0xff] }
 0x2ab   :  { %v500_v57 = vadd.f32 1e-05, %v498_v55  ;;  %v2186_v55 = vpack.c.bf16 %v796_v54, %v794_v53  ;;  %v834_v53 = vld [vmem:[#allocation7 + $0x5e8] sm:$0xff]  ;;  %v836_v54 = vld [vmem:[#allocation7 + $0x5f8] sm:$0xff] }
 0x2ac   :  { %2436 = vrsqrt.f32 %v499_v56  ;;  %v793_v56 = vld [vmem:[#allocation7 + $0x4a0] sm:$0xff] }
 0x2ad   :  { %2438 = vrsqrt.f32 %v500_v57  ;;  %v795_v57 = vld [vmem:[#allocation7 + $0x4b0] sm:$0xff] }
 0x2ae   :  { %v2188_v58 = vpack.c.bf16 %v795_v57, %v793_v56  ;;  %v2226_v56 = vpack.c.bf16 %v836_v54, %v834_v53  ;;  %v833_v57 = vld [vmem:[#allocation7 + $0x5e0] sm:$0xff]  ;;  %v966_v53 = vld [vmem:[#allocation7 + $0x710] sm:$0xff]  ;;  %v969_v54 = vld [vmem:[#allocation7 + $0x728] sm:$0xff] }
 0x2b6   :  { %v2437_v61 = vpop.eup %2436 }
 0x2b7   :  { %v2439_v63 = vpop.eup %2438  ;;  %v503_v1 = vmul.f32 %v2437_v61, %v479_v36  ;;  %v784_v36 = vld [vmem:[#allocation7 + $0x458] sm:$0xff] }
 0x2b8   :  { %v504_v3 = vmul.f32 %v2439_v63, %v480_v37  ;;  %v2174_v37 = vpack.c.bf16 %v784_v36, %v782_v35  ;;  %v799_v63 = vld [vmem:[#allocation7 + $0x4d0] sm:$0xff]  ;;  %v2212_v35 = vpack.c.bf16 %v819_v34, %v817_v33  ;;  %v822_v36 = vld [vmem:[#allocation7 + $0x588] sm:$0xff]  ;;  %v2250_v33 = vpack.c.bf16 %v955_v31, %v953_v30  ;;  %v952_v34 = vld [vmem:[#allocation7 + $0x6a0] sm:$0xff] }
 0x2b9   :  { %v516_v5 = vmul.f32 %v509_v60, %v503_v1  ;;  %v800_v60 = vld [vmem:[#allocation7 + $0x4d8] sm:$0xff] }
 0x2ba   :  { %v517_v6 = vmul.f32 %v513_v62, %v504_v3  ;;  %2175 = vmatprep.subr.bf16.mxu1 %v2174_v37  ;;  %v2190_v61 = vpack.c.bf16 %v800_v60, %v798_v59  ;;  %v797_v62 = vld [vmem:[#allocation7 + $0x4c0] sm:$0xff]  ;;  %v804_v3 = vld [vmem:[#allocation7 + $0x4f8] sm:$0xff]  ;;  %v933_v60 = vld [vmem:[#allocation7 + $0x608] sm:$0xff] }
 0x2bb   :  { %v529_v7 = vadd.f32 %v522_v2, %v516_v5  ;;  %2177 = vmatpush1.bf16.msra.mxu1 %v2176_v40  ;;  %v2192_v1 = vpack.c.bf16 %v799_v63, %v797_v62  ;;  %v802_v2 = vld [vmem:[#allocation7 + $0x4e8] sm:$0xff]  ;;  %v801_v5 = vld [vmem:[#allocation7 + $0x4e0] sm:$0xff]  ;;  %v824_v37 = vld [vmem:[#allocation7 + $0x598] sm:$0xff] }
 0x2bc   :  { %v530_v8 = vadd.f32 %v526_v4, %v517_v6  ;;  %2179 = vmatprep.subr.bf16.mxu1 %v2178_v43  ;;  %v2194_v4 = vpack.c.bf16 %v804_v3, %v802_v2  ;;  %v803_v6 = vld [vmem:[#allocation7 + $0x4f0] sm:$0xff]  ;;  %v2214_v38 = vpack.c.bf16 %v824_v37, %v822_v36  ;;  %v828_v43 = vld [vmem:[#allocation7 + $0x5b8] sm:$0xff]  ;;  %v932_v62 = vld [vmem:[#allocation7 + $0x600] sm:$0xff] }
 0x2bd   :  { %v533_v9 = vmul.f32 0.70710677, %v529_v7  ;;  %v531_v16 = vmul.f32 0.5, %v529_v7  ;;  %v2196_v7 = vpack.c.bf16 %v803_v6, %v801_v5  ;;  %v823_v40 = vld [vmem:[#allocation7 + $0x590] sm:$0xff]  ;;  %v2218_v45 = vpack.c.bf16 %v828_v43, %v826_v42  ;;  %v937_v2 = vld [vmem:[#allocation7 + $0x628] sm:$0xff]  ;;  %v939_v3 = vld [vmem:[#allocation7 + $0x638] sm:$0xff] }
 0x2be   :  { %v534_v10 = vmul.f32 0.70710677, %v530_v8  ;;  %v532_v14 = vmul.f32 0.5, %v530_v8  ;;  %v806_v8 = vld [vmem:[#allocation7 + $0x508] sm:$0xff]  ;;  %v2216_v41 = vpack.c.bf16 %v823_v40, %v821_v39  ;;  %v2234_v5 = vpack.c.bf16 %v939_v3, %v937_v2  ;;  %v936_v6 = vld [vmem:[#allocation7 + $0x620] sm:$0xff]  ;;  %v959_v37 = vld [vmem:[#allocation7 + $0x6d8] sm:$0xff] }
 0x2bf   :  { %2440 = verf.f32 %v533_v9  ;;  %2181 = vmatpush1.bf16.msra.mxu1 %v2180_v46  ;;  %v808_v9 = vld [vmem:[#allocation7 + $0x518] sm:$0xff]  ;;  %v827_v46 = vld [vmem:[#allocation7 + $0x5b0] sm:$0xff]  ;;  %v957_v36 = vld [vmem:[#allocation7 + $0x6c8] sm:$0xff] }
 0x2c0   :  { %2442 = verf.f32 %v534_v10  ;;  %2183 = vmatprep.subr.bf16.mxu1 %v2182_v49  ;;  %v2198_v10 = vpack.c.bf16 %v808_v9, %v806_v8  ;;  %v2220_v49 = vpack.c.bf16 %v827_v46, %v825_v44  ;;  %v941_v8 = vld [vmem:[#allocation7 + $0x648] sm:$0xff]  ;;  %v943_v9 = vld [vmem:[#allocation7 + $0x658] sm:$0xff]  ;;  %v2254_v39 = vpack.c.bf16 %v959_v37, %v957_v36  ;;  %v956_v40 = vld [vmem:[#allocation7 + $0x6c0] sm:$0xff] }
 0x2c1   :  { %v961_v42 = vld [vmem:[#allocation7 + $0x6e8] sm:$0xff]  ;;  %v963_v43 = vld [vmem:[#allocation7 + $0x6f8] sm:$0xff]  ;;  %v960_v46 = vld [vmem:[#allocation7 + $0x6e0] sm:$0xff] }
 0x2c2   :  { %v974_v2 = vld [vmem:[#allocation7 + $0x750] sm:$0xff] }
 0x2c3   :  { %2185 = vmatpush1.bf16.msra.mxu1 %v2184_v52  ;;  %v831_v52 = vld [vmem:[#allocation7 + $0x5d0] sm:$0xff] }
 0x2c4   :  { %2187 = vmatprep.subr.bf16.mxu1 %v2186_v55  ;;  %v2224_v55 = vpack.c.bf16 %v831_v52, %v829_v51  ;;  %v964_v52 = vld [vmem:[#allocation7 + $0x700] sm:$0xff] }
 0x2c7   :  { %2189 = vmatpush1.bf16.msra.mxu1 %v2188_v58  ;;  %v835_v58 = vld [vmem:[#allocation7 + $0x5f0] sm:$0xff] }
 0x2c8   :  { %2191 = vmatprep.subr.bf16.mxu1 %v2190_v61  ;;  %v2228_v59 = vpack.c.bf16 %v835_v58, %v833_v57  ;;  %v935_v61 = vld [vmem:[#allocation7 + $0x618] sm:$0xff]  ;;  %v968_v58 = vld [vmem:[#allocation7 + $0x720] sm:$0xff] }
 0x2c9   :  { %v2441_v11 = vpop.eup %2440  ;;  %v2230_v63 = vpack.c.bf16 %v935_v61, %v933_v60  ;;  %v973_v60 = vld [vmem:[#allocation7 + $0x748] sm:$0xff]  ;;  %v975_v61 = vld [vmem:[#allocation7 + $0x758] sm:$0xff] }
 0x2ca   :  { %v2443_v12 = vpop.eup %2442  ;;  %v537_v13 = vadd.f32 1.0, %v2441_v11  ;;  %v805_v11 = vld [vmem:[#allocation7 + $0x500] sm:$0xff] }
 0x2cb   :  { %v538_v15 = vadd.f32 1.0, %v2443_v12  ;;  %2193 = vmatpush1.bf16.msra.mxu1 %v2192_v1  ;;  %v807_v12 = vld [vmem:[#allocation7 + $0x510] sm:$0xff]  ;;  %2231 = vmatprep.subr.bf16.mxu0 %v2230_v63  ;;  %v2270_v63 = vpack.c.bf16 %v975_v61, %v973_v60 }
 0x2cc   :  { %v539_v18 = vmul.f32 %v537_v13, %v531_v16  ;;  %2195 = vmatprep.subr.bf16.mxu1 %v2194_v4  ;;  %v2200_v13 = vpack.c.bf16 %v807_v12, %v805_v11  ;;  %v934_v1 = vld [vmem:[#allocation7 + $0x610] sm:$0xff]  ;;  %v2238_v11 = vpack.c.bf16 %v943_v9, %v941_v8  ;;  %v940_v12 = vld [vmem:[#allocation7 + $0x640] sm:$0xff] }
 0x2cd   :  { %v540_v17 = vmul.f32 %v538_v15, %v532_v14  ;;  %v810_v14 = vld [vmem:[#allocation7 + $0x528] sm:$0xff]  ;;  %v812_v15 = vld [vmem:[#allocation7 + $0x538] sm:$0xff]  ;;  %v2232_v4 = vpack.c.bf16 %v934_v1, %v932_v62  ;;  %v972_v1 = vld [vmem:[#allocation7 + $0x740] sm:$0xff] }
 0x2ce   :  { %v2202_v16 = vpack.c.bf16 %v812_v15, %v810_v14  ;;  %v945_v14 = vld [vmem:[#allocation7 + $0x668] sm:$0xff]  ;;  %v947_v15 = vld [vmem:[#allocation7 + $0x678] sm:$0xff]  ;;  %v2272_v3 = vpack.c.bf16 %v974_v2, %v972_v1 }
 0x2cf   :  { %683 = vmatprep.mubr.f32.mxu0 %v540_v17  ;;  %2197 = vmatpush1.bf16.msra.mxu1 %v2196_v7  ;;  %v809_v17 = vld [vmem:[#allocation7 + $0x520] sm:$0xff]  ;;  %v938_v7 = vld [vmem:[#allocation7 + $0x630] sm:$0xff] }
 0x2d0   :  { %684 = vmatmul.mubr.f32.vlgmr.msra.gmra.mrb[2].mxu0 %v539_v18  ;;  %2199 = vmatprep.subr.bf16.mxu1 %v2198_v10  ;;  %v811_v18 = vld [vmem:[#allocation7 + $0x530] sm:$0xff]  ;;  %v2236_v10 = vpack.c.bf16 %v938_v7, %v936_v6 }
 0x2d1   :  { %v2204_v19 = vpack.c.bf16 %v811_v18, %v809_v17  ;;  %2233 = vmatpush1.bf16.msra.mxu0 %v2232_v4  ;;  %v2242_v17 = vpack.c.bf16 %v947_v15, %v945_v14  ;;  %v944_v18 = vld [vmem:[#allocation7 + $0x660] sm:$0xff] }
 0x2d2   :  { %2235 = vmatprep.subr.bf16.mxu0 %v2234_v5  ;;  %v607_v4 = vld [vmem:[#allocation8 + $0x2] ss:$8 sm:$0x3] }
 0x2d3   :  { %2201 = vmatpush1.bf16.msra.mxu1 %v2200_v13  ;;  %v942_v13 = vld [vmem:[#allocation7 + $0x650] sm:$0xff]  ;;  %v612_v5 = vrot.slane %v607_v4, %v2780_v22  ;;  %v616_v6 = vrot.slane %v607_v4, %v2782_v24 }
 0x2d4   :  { %2203 = vmatprep.subr.bf16.mxu1 %v2202_v16  ;;  %v2240_v16 = vpack.c.bf16 %v942_v13, %v940_v12 }
 0x2d5   :  { %2237 = vmatpush1.bf16.msra.mxu0 %v2236_v10 }
 0x2d6   :  { %2239 = vmatprep.subr.bf16.mxu0 %v2238_v11 }
 0x2d7   :  { %2205 = vmatpush1.bf16.msra.mxu1 %v2204_v19  ;;  %v946_v19 = vld [vmem:[#allocation7 + $0x670] sm:$0xff] }
 0x2d8   :  { %2207 = vmatprep.subr.bf16.mxu1 %v2206_v25  ;;  %v2244_v25 = vpack.c.bf16 %v946_v19, %v944_v18 }
 0x2d9   :  { %2241 = vmatpush1.bf16.msra.mxu0 %v2240_v16 }
 0x2da   :  { %2243 = vmatprep.subr.bf16.mxu0 %v2242_v17 }
 0x2db   :  { %2209 = vmatpush1.bf16.msra.mxu1 %v2208_v29  ;;  %v950_v29 = vld [vmem:[#allocation7 + $0x690] sm:$0xff] }
 0x2dc   :  { %2211 = vmatprep.subr.bf16.mxu1 %v2210_v32  ;;  %v2248_v32 = vpack.c.bf16 %v950_v29, %v948_v28 }
 0x2dd   :  { %2245 = vmatpush1.bf16.msra.mxu0 %v2244_v25 }
 0x2de   :  { %2247 = vmatprep.subr.bf16.mxu0 %v2246_v26 }
 0x2df   :  { %2213 = vmatpush1.bf16.msra.mxu1 %v2212_v35  ;;  %v954_v35 = vld [vmem:[#allocation7 + $0x6b0] sm:$0xff] }
 0x2e0   :  { %2215 = vmatprep.subr.bf16.mxu1 %v2214_v38  ;;  %v2252_v38 = vpack.c.bf16 %v954_v35, %v952_v34 }
 0x2e1   :  { %2249 = vmatpush1.bf16.msra.mxu0 %v2248_v32 }
 0x2e2   :  { %2251 = vmatprep.subr.bf16.mxu0 %v2250_v33 }
 0x2e3   :  { %2217 = vmatpush1.bf16.msra.mxu1 %v2216_v41  ;;  %v958_v41 = vld [vmem:[#allocation7 + $0x6d0] sm:$0xff] }
 0x2e4   :  { %2219 = vmatprep.subr.bf16.mxu1 %v2218_v45  ;;  %v2256_v44 = vpack.c.bf16 %v958_v41, %v956_v40  ;;  %v2258_v45 = vpack.c.bf16 %v963_v43, %v961_v42 }
 0x2e5   :  { %2253 = vmatpush1.bf16.msra.mxu0 %v2252_v38 }
 0x2e6   :  { %2255 = vmatprep.subr.bf16.mxu0 %v2254_v39 }
 0x2e7   :  { %2221 = vmatpush1.bf16.msra.mxu1 %v2220_v49  ;;  %v967_v49 = vld [vmem:[#allocation7 + $0x718] sm:$0xff] }
 0x2e8   :  { %2223 = vmatprep.subr.bf16.mxu1 %v2222_v50  ;;  %v2260_v50 = vpack.c.bf16 %v962_v47, %v960_v46  ;;  %v2262_v51 = vpack.c.bf16 %v967_v49, %v965_v48 }
 0x2e9   :  { %2257 = vmatpush1.bf16.msra.mxu0 %v2256_v44 }
 0x2ea   :  { %2259 = vmatprep.subr.bf16.mxu0 %v2258_v45 }
 0x2eb   :  { %2225 = vmatpush1.bf16.msra.mxu1 %v2224_v55  ;;  %v971_v55 = vld [vmem:[#allocation7 + $0x738] sm:$0xff] }
 0x2ec   :  { %2227 = vmatprep.subr.bf16.mxu1 %v2226_v56  ;;  %v2264_v56 = vpack.c.bf16 %v966_v53, %v964_v52  ;;  %v2266_v57 = vpack.c.bf16 %v971_v55, %v969_v54  ;;  %v691_v53 = vld [vmem:[#allocation8 + $0x12] ss:$8 sm:$0x3]  ;;  %v693_v54 = vld [vmem:[#allocation8 + $0x22] ss:$8 sm:$0x3] }
 0x2ed   :  { %2261 = vmatpush1.bf16.msra.mxu0 %v2260_v50  ;;  %v740_v55 = vrot.slane %v691_v53, %v2780_v22  ;;  %v753_v60 = vrot.slane %v693_v54, %v2780_v22 }
 0x2ee   :  { %2263 = vmatprep.subr.bf16.mxu0 %v2262_v51 }
 0x2ef   :  { %2229 = vmatpush1.bf16.msra.mxu1 %v2228_v59  ;;  %v970_v59 = vld [vmem:[#allocation7 + $0x730] sm:$0xff] }
 0x2f0   :  { %v2268_v62 = vpack.c.bf16 %v970_v59, %v968_v58 }
 0x2f1   :  { %2265 = vmatpush1.bf16.msra.mxu0 %v2264_v56 }
 0x2f2   :  { %2267 = vmatprep.subr.bf16.mxu0 %v2266_v57  ;;  %v744_v57 = vrot.slane %v691_v53, %v2782_v24  ;;  %v1078_v53 = vld [vmem:[#allocation10 + $0x18] sm:$0xff] }
 0x2f5   :  { %2269 = vmatpush1.bf16.msra.mxu0 %v2268_v62  ;;  %v757_v62 = vrot.slane %v693_v54, %v2782_v24 }
 0x2f6   :  { %2271 = vmatprep.subr.bf16.mxu0 %v2270_v63 }
 0x2f9   :  { %2273 = vmatpush1.bf16.msra.mxu0 %v2272_v3 }
 0x3a3   :  { %v685_v7 = vpop.f32.mrb[2].mxu0 }
 0x3a4   :  { %v686_v8 = vadd.f32 %v685_v7, %v612_v5  ;;  %v687_v9 = vpop.f32.mrb[3].mxu0 }
 0x3a5   :  { %v688_v10 = vadd.f32 %v687_v9, %v616_v6 }
 0x3a6   :  { %v694_v11 = vmul.f32 %v2787_v27, %v686_v8 }
 0x3a7   :  { %v695_v12 = vmul.f32 %v2787_v27, %v688_v10 }
 0x3a8   :  { %v696_v13 = vrot.slane %v694_v11, 4 }
 0x3a9   :  { %v702_v14 = vrot.slane %v695_v12, 4 }
 0x3aa   :  { %v697_v15 = vadd.f32 %v696_v13, %v694_v11 }
 0x3ab   :  { %v703_v16 = vadd.f32 %v702_v14, %v695_v12  ;;  %v977_v14 = vld [vmem:[#allocation7 + $0x768] sm:$0xff] }
 0x3ac   :  { %v698_v17 = vrot.slane %v697_v15, 2 }
 0x3ad   :  { %v704_v18 = vrot.slane %v703_v16, 2 }
 0x3ae   :  { %v699_v19 = vadd.f32 %v698_v17, %v697_v15  ;;  %v979_v15 = vld [vmem:[#allocation7 + $0x778] sm:$0xff]  ;;  %v976_v17 = vld [vmem:[#allocation7 + $0x760] sm:$0xff] }
 0x3af   :  { %v705_v21 = vadd.f32 %v704_v18, %v703_v16  ;;  %v2274_v16 = vpack.c.bf16 %v979_v15, %v977_v14  ;;  %v978_v18 = vld [vmem:[#allocation7 + $0x770] sm:$0xff] }
 0x3b0   :  { %v700_v23 = vrot.slane %v699_v19, 1 }
 0x3b1   :  { %v706_v25 = vrot.slane %v705_v21, 1  ;;  %2275 = vmatprep.subr.bf16.mxu0 %v2274_v16 }
 0x3b2   :  { %v701_v26 = vadd.f32 %v700_v23, %v699_v19  ;;  %v2276_v19 = vpack.c.bf16 %v978_v18, %v976_v17  ;;  %v983_v23 = vld [vmem:[#allocation7 + $0x798] sm:$0xff]  ;;  %v1085_v18 = vld [vmem:[#allocation10 + $0x50] sm:$0xff] }
 0x3b3   :  { %v707_v28 = vadd.f32 %v706_v25, %v705_v21  ;;  %v981_v21 = vld [vmem:[#allocation7 + $0x788] sm:$0xff] }
 0x3b4   :  { %v708_v29 = vmul.f32 0.5, %v701_v26  ;;  %2277 = vmatpush1.bf16.msra.mxu0 %v2276_v19  ;;  %v2278_v25 = vpack.c.bf16 %v983_v23, %v981_v21  ;;  %v980_v26 = vld [vmem:[#allocation7 + $0x780] sm:$0xff]  ;;  %v1087_v21 = vld [vmem:[#allocation10 + $0x60] sm:$0xff]  ;;  %v1088_v23 = vld [vmem:[#allocation10 + $0x68] sm:$0xff] }
 0x3b5   :  { %v709_v30 = vmul.f32 0.5, %v707_v28  ;;  %v982_v28 = vld [vmem:[#allocation7 + $0x790] sm:$0xff] }
 0x3b6   :  { %v710_v31 = vsub.f32 %v686_v8, %v708_v29  ;;  %v2280_v29 = vpack.c.bf16 %v982_v28, %v980_v26  ;;  %2279 = vmatprep.subr.bf16.mxu0 %v2278_v25  ;;  %v2313_v25 = vpack.c.bf16 %v1088_v23, %v1087_v21  ;;  %v1089_v26 = vld [vmem:[#allocation10 + $0x70] sm:$0xff]  ;;  %v1090_v28 = vld [vmem:[#allocation10 + $0x78] sm:$0xff]  ;;  %v1734_v21 = vld [vmem:[#allocation11 + $0x8] ss:$0 sm:$0xff] }
 0x3b7   :  { %v711_v32 = vsub.f32 %v688_v10, %v709_v30  ;;  %v985_v30 = vld [vmem:[#allocation7 + $0x7a8] sm:$0xff] }
 0x3b8   :  { %v712_v33 = vmul.f32 %v2787_v27, %v710_v31  ;;  %2281 = vmatpush1.bf16.msra.mxu0 %v2280_v29  ;;  %v2316_v29 = vpack.c.bf16 %v1090_v28, %v1089_v26 }
 0x3b9   :  { %v713_v34 = vmul.f32 %v2787_v27, %v711_v32 }
 0x3ba   :  { %v714_v35 = vmul.f32 %v712_v33, %v712_v33  ;;  %v984_v33 = vld [vmem:[#allocation7 + $0x7a0] sm:$0xff] }
 0x3bb   :  { %v715_v36 = vmul.f32 %v713_v34, %v713_v34  ;;  %v986_v34 = vld [vmem:[#allocation7 + $0x7b0] sm:$0xff] }
 0x3bc   :  { %v716_v37 = vrot.slane %v714_v35, 4 }
 0x3bd   :  { %v722_v38 = vrot.slane %v715_v36, 4 }
 0x3be   :  { %v717_v39 = vadd.f32 %v716_v37, %v714_v35  ;;  %v2284_v35 = vpack.c.bf16 %v986_v34, %v984_v33  ;;  %v991_v37 = vld [vmem:[#allocation7 + $0x7d8] sm:$0xff] }
 0x3bf   :  { %v723_v40 = vadd.f32 %v722_v38, %v715_v36  ;;  %v989_v36 = vld [vmem:[#allocation7 + $0x7c8] sm:$0xff] }
 0x3c0   :  { %v718_v41 = vrot.slane %v717_v39, 2  ;;  %v2286_v38 = vpack.c.bf16 %v991_v37, %v989_v36  ;;  %v1205_v36 = vld [vmem:[#allocation10 + $0x80] sm:$0xff]  ;;  %v1206_v37 = vld [vmem:[#allocation10 + $0x88] sm:$0xff] }
 0x3c1   :  { %v724_v42 = vrot.slane %v723_v40, 2 }
 0x3c2   :  { %v719_v43 = vadd.f32 %v718_v41, %v717_v39  ;;  %v988_v39 = vld [vmem:[#allocation7 + $0x7c0] sm:$0xff] }
 0x3c3   :  { %v725_v44 = vadd.f32 %v724_v42, %v723_v40  ;;  %v990_v40 = vld [vmem:[#allocation7 + $0x7d0] sm:$0xff]  ;;  %v993_v42 = vld [vmem:[#allocation7 + $0x7e8] sm:$0xff] }
 0x3c4   :  { %v720_v45 = vrot.slane %v719_v43, 1  ;;  %v2288_v41 = vpack.c.bf16 %v990_v40, %v988_v39  ;;  %v1207_v39 = vld [vmem:[#allocation10 + $0x90] sm:$0xff]  ;;  %v1208_v40 = vld [vmem:[#allocation10 + $0x98] sm:$0xff] }
 0x3c5   :  { %v726_v46 = vrot.slane %v725_v44, 1 }
 0x3c6   :  { %v721_v47 = vadd.f32 %v720_v45, %v719_v43  ;;  %v995_v43 = vld [vmem:[#allocation7 + $0x7f8] sm:$0xff]  ;;  %v992_v45 = vld [vmem:[#allocation7 + $0x7e0] sm:$0xff] }
 0x3c7   :  { %v727_v48 = vadd.f32 %v726_v46, %v725_v44  ;;  %v2290_v44 = vpack.c.bf16 %v995_v43, %v993_v42  ;;  %v994_v46 = vld [vmem:[#allocation7 + $0x7f0] sm:$0xff]  ;;  %v1210_v42 = vld [vmem:[#allocation10 + $0xa8] sm:$0xff] }
 0x3c8   :  { %v728_v49 = vmul.f32 0.5, %v721_v47  ;;  %v2292_v47 = vpack.c.bf16 %v994_v46, %v992_v45  ;;  %v1212_v45 = vld [vmem:[#allocation10 + $0xb8] sm:$0xff] }
 0x3c9   :  { %v729_v50 = vmul.f32 0.5, %v727_v48  ;;  %v1075_v48 = vld [vmem:[#allocation10] sm:$0xff] }
 0x3ca   :  { %v730_v51 = vadd.f32 1e-05, %v728_v49  ;;  %v1076_v49 = vld [vmem:[#allocation10 + $0x8] sm:$0xff] }
 0x3cb   :  { %v731_v52 = vadd.f32 1e-05, %v729_v50  ;;  %v1077_v50 = vld [vmem:[#allocation10 + $0x10] sm:$0xff] }
 0x3cc   :  { %2444 = vrsqrt.f32 %v730_v51  ;;  %v2659_v51 = vmov 0.0|0.0   ;;  %v2298_v54 = vpack.c.bf16 %v1078_v53, %v1077_v50  ;;  %v1215_v50 = vld [vmem:[#allocation10 + $0xd0] sm:$0xff] }
 0x3cd   :  { %2446 = vrsqrt.f32 %v731_v52  ;;  %2294 = vmatprep.subr.bf16.mxu1 %v2659_v51  ;;  %v2295_v52 = vpack.c.bf16 %v1076_v49, %v1075_v48  ;;  %v1214_v48 = vld [vmem:[#allocation10 + $0xc8] sm:$0xff] }
 0x3d6   :  { %v2445_v56 = vpop.eup %2444 }
 0x3d7   :  { %v2447_v58 = vpop.eup %2446  ;;  %v734_v59 = vmul.f32 %v2445_v56, %v710_v31  ;;  %v987_v31 = vld [vmem:[#allocation7 + $0x7b8] sm:$0xff] }
 0x3d8   :  { %v735_v61 = vmul.f32 %v2447_v58, %v711_v32  ;;  %v2282_v32 = vpack.c.bf16 %v987_v31, %v985_v30  ;;  %v1080_v56 = vld [vmem:[#allocation10 + $0x28] sm:$0xff]  ;;  %v1081_v58 = vld [vmem:[#allocation10 + $0x30] sm:$0xff] }
 0x3d9   :  { %v747_v63 = vmul.f32 %v740_v55, %v734_v59  ;;  %v1079_v55 = vld [vmem:[#allocation10 + $0x20] sm:$0xff]  ;;  %v1082_v59 = vld [vmem:[#allocation10 + $0x38] sm:$0xff] }
 0x3da   :  { %v748_v1 = vmul.f32 %v744_v57, %v735_v61  ;;  %2283 = vmatprep.subr.bf16.mxu0 %v2282_v32  ;;  %v2301_v57 = vpack.c.bf16 %v1080_v56, %v1079_v55  ;;  %v1083_v61 = vld [vmem:[#allocation10 + $0x40] sm:$0xff]  ;;  %v997_v30 = vld [vmem:[#allocation8 + $0x4] ss:$8 sm:$0x3]  ;;  %v1218_v55 = vld [vmem:[#allocation10 + $0xe8] sm:$0xff] }
 0x3db   :  { %v760_v2 = vadd.f32 %v753_v60, %v747_v63  ;;  %2285 = vmatpush1.bf16.msra.mxu0 %v2284_v35  ;;  %v2304_v60 = vpack.c.bf16 %v1082_v59, %v1081_v58  ;;  %v1002_v31 = vrot.slane %v997_v30, %v2780_v22  ;;  %v1220_v58 = vld [vmem:[#allocation10 + $0xf8] sm:$0xff] }
 0x3dc   :  { %v761_v3 = vadd.f32 %v757_v62, %v748_v1  ;;  %2287 = vmatprep.subr.bf16.mxu0 %v2286_v38  ;;  %v1084_v62 = vld [vmem:[#allocation10 + $0x48] sm:$0xff]  ;;  %v838_v1 = vld [vmem:[#allocation8 + $0x3] ss:$8 sm:$0x3]  ;;  %v2319_v38 = vpack.c.bf16 %v1206_v37, %v1205_v36 }
 0x3dd   :  { %v764_v4 = vmul.f32 0.70710677, %v760_v2  ;;  %v762_v11 = vmul.f32 0.5, %v760_v2  ;;  %v2307_v63 = vpack.c.bf16 %v1084_v62, %v1083_v61  ;;  %v843_v2 = vrot.slane %v838_v1, %v2780_v22  ;;  %v1209_v22 = vld [vmem:[#allocation10 + $0xa0] sm:$0xff]  ;;  %v1337_v37 = vld [vmem:[#allocation10 + $0x110] sm:$0xff] }
 0x3de   :  { %v765_v5 = vmul.f32 0.70710677, %v761_v3  ;;  %v763_v9 = vmul.f32 0.5, %v761_v3  ;;  %v847_v3 = vrot.slane %v838_v1, %v2782_v24  ;;  %v1086_v24 = vld [vmem:[#allocation10 + $0x58] sm:$0xff]  ;;  %v2325_v43 = vpack.c.bf16 %v1210_v42, %v1209_v22  ;;  %v1341_v42 = vld [vmem:[#allocation10 + $0x130] sm:$0xff] }
 0x3df   :  { %2448 = verf.f32 %v764_v4  ;;  %2289 = vmatpush1.bf16.msra.mxu0 %v2288_v41  ;;  %v2310_v19 = vpack.c.bf16 %v1086_v24, %v1085_v18  ;;  %v2322_v41 = vpack.c.bf16 %v1208_v40, %v1207_v39  ;;  %v1339_v40 = vld [vmem:[#allocation10 + $0x120] sm:$0xff] }
 0x3e0   :  { %2450 = verf.f32 %v765_v5  ;;  %2291 = vmatprep.subr.bf16.mxu0 %v2290_v44  ;;  %v1211_v44 = vld [vmem:[#allocation10 + $0xb0] sm:$0xff] }
 0x3e1   :  { %v2328_v46 = vpack.c.bf16 %v1212_v45, %v1211_v44  ;;  %v1343_v45 = vld [vmem:[#allocation10 + $0x140] sm:$0xff] }
 0x3e3   :  { %2293 = vmatpush1.bf16.msra.mxu0 %v2292_v47  ;;  %v1213_v47 = vld [vmem:[#allocation10 + $0xc0] sm:$0xff] }
 0x3e4   :  { %2318 = vmatprep.subr.bf16.mxu0 %v2659_v51  ;;  %v2331_v49 = vpack.c.bf16 %v1214_v48, %v1213_v47  ;;  %v1345_v48 = vld [vmem:[#allocation10 + $0x150] sm:$0xff] }
 0x3e9   :  { %v2449_v6 = vpop.eup %2448 }
 0x3ea   :  { %v2451_v7 = vpop.eup %2450  ;;  %v768_v8 = vadd.f32 1.0, %v2449_v6 }
 0x3eb   :  { %v769_v10 = vadd.f32 1.0, %v2451_v7 }
 0x3ec   :  { %v770_v13 = vmul.f32 %v768_v8, %v762_v11 }
 0x3ed   :  { %v771_v12 = vmul.f32 %v769_v10, %v763_v9 }
 0x3ef   :  { %914 = vmatprep.mubr.f32.mxu1 %v771_v12 }
 0x3f0   :  { %915 = vmatmul.mubr.f32.vlgmr.msra.gmra.mrb[2].mxu1 %v770_v13 }
 0x3f1   :  { %2296 = vmatpush3.bf16.msra.mxu1 %v2295_v52  ;;  %1863 = vmatprep.mubr.msk.f32.mxu1 %vm2660_vm1, %v2658_v0  ;;  %v1216_v52 = vld [vmem:[#allocation10 + $0xd8] sm:$0xff] }
 0x3f2   :  { %2297 = vmatprep.subr.bf16.mxu1 %v2659_v51  ;;  %v2334_v53 = vpack.c.bf16 %v1216_v52, %v1215_v50  ;;  %v1347_v52 = vld [vmem:[#allocation10 + $0x160] sm:$0xff] }
 0x3f5   :  { %2299 = vmatpush3.bf16.msra.mxu1 %v2298_v54  ;;  %v1217_v54 = vld [vmem:[#allocation10 + $0xe0] sm:$0xff] }
 0x3f6   :  { %2300 = vmatprep.subr.bf16.mxu1 %v2659_v51  ;;  %v2337_v56 = vpack.c.bf16 %v1218_v55, %v1217_v54  ;;  %v1349_v55 = vld [vmem:[#allocation10 + $0x170] sm:$0xff] }
 0x3f9   :  { %2302 = vmatpush3.bf16.msra.mxu1 %v2301_v57  ;;  %v1219_v57 = vld [vmem:[#allocation10 + $0xf0] sm:$0xff] }
 0x3fa   :  { %2303 = vmatprep.subr.bf16.mxu1 %v2659_v51  ;;  %v2340_v59 = vpack.c.bf16 %v1220_v58, %v1219_v57  ;;  %v1736_v58 = vld [vmem:[#allocation11 + $0x1] ss:$0 sm:$0xff] }
 0x3fd   :  { %2305 = vmatpush3.bf16.msra.mxu1 %v2304_v60  ;;  %v1733_v60 = vld [vmem:[#allocation11] ss:$0 sm:$0xff] }
 0x3fe   :  { %2306 = vmatprep.subr.bf16.mxu1 %v2659_v51 }
 0x401   :  { %2308 = vmatpush3.bf16.msra.mxu1 %v2307_v63 }
 0x402   :  { %2309 = vmatprep.subr.bf16.mxu1 %v2659_v51 }
 0x405   :  { %2311 = vmatpush3.bf16.msra.mxu1 %v2310_v19 }
 0x406   :  { %2312 = vmatprep.subr.bf16.mxu1 %v2659_v51 }
 0x409   :  { %2314 = vmatpush3.bf16.msra.mxu1 %v2313_v25  ;;  %v1735_v25 = vld [vmem:[#allocation11 + $0x10] ss:$0 sm:$0xff] }
 0x40a   :  { %2315 = vmatprep.subr.bf16.mxu1 %v2659_v51 }
 0x40d   :  { %2317 = vmatpush3.bf16.msra.mxu1 %v2316_v29 }
 0x40e   :  { %2342 = vmatprep.subr.bf16.mxu1 %v2659_v51 }
 0x4c3   :  { %v916_v4 = vpop.f32.mrb[2].mxu1 }
 0x4c4   :  { %v917_v5 = vadd.f32 %v916_v4, %v843_v2  ;;  %v918_v6 = vpop.f32.mrb[3].mxu1 }
 0x4c5   :  { %v919_v7 = vadd.f32 %v918_v6, %v847_v3 }
 0x4c6   :  { %v923_v8 = vmul.f32 0.70710677, %v917_v5  ;;  %v921_v15 = vmul.f32 0.5, %v917_v5 }
 0x4c7   :  { %v924_v9 = vmul.f32 0.70710677, %v919_v7  ;;  %v922_v13 = vmul.f32 0.5, %v919_v7 }
 0x4c8   :  { %2452 = verf.f32 %v923_v8 }
 0x4c9   :  { %2454 = verf.f32 %v924_v9 }
 0x4d2   :  { %v2453_v10 = vpop.eup %2452 }
 0x4d3   :  { %v2455_v11 = vpop.eup %2454  ;;  %v927_v12 = vadd.f32 1.0, %v2453_v10 }
 0x4d4   :  { %v928_v14 = vadd.f32 1.0, %v2455_v11 }
 0x4d5   :  { %v929_v17 = vmul.f32 %v927_v12, %v921_v15 }
 0x4d6   :  { %v930_v16 = vmul.f32 %v928_v14, %v922_v13 }
 0x4d8   :  { %1068 = vmatprep.mubr.f32.mxu0 %v930_v16 }
 0x4d9   :  { %1069 = vmatmul.mubr.f32.vlgmr.msra.gmra.mrb[4].mxu0 %v929_v17 }
 0x4da   :  { %1898 = vmatprep.mubr.msk.f32.mxu0 %vm2660_vm1, %v2658_v0  ;;  %2320 = vmatpush3.bf16.msra.mxu0 %v2319_v38  ;;  %v1338_v38 = vld [vmem:[#allocation10 + $0x118] sm:$0xff] }
 0x4db   :  { %2321 = vmatprep.subr.bf16.mxu0 %v2659_v51  ;;  %v2346_v39 = vpack.c.bf16 %v1338_v38, %v1337_v37  ;;  %v1469_v38 = vld [vmem:[#allocation10 + $0x1a0] sm:$0xff] }
 0x4de   :  { %2323 = vmatpush3.bf16.msra.mxu0 %v2322_v41  ;;  %v1340_v41 = vld [vmem:[#allocation10 + $0x128] sm:$0xff] }
 0x4df   :  { %2324 = vmatprep.subr.bf16.mxu0 %v2659_v51  ;;  %v2349_v22 = vpack.c.bf16 %v1340_v41, %v1339_v40  ;;  %v1471_v41 = vld [vmem:[#allocation10 + $0x1b0] sm:$0xff] }
 0x4e2   :  { %2326 = vmatpush3.bf16.msra.mxu0 %v2325_v43  ;;  %v1342_v43 = vld [vmem:[#allocation10 + $0x138] sm:$0xff] }
 0x4e3   :  { %2327 = vmatprep.subr.bf16.mxu0 %v2659_v51  ;;  %v2352_v44 = vpack.c.bf16 %v1342_v43, %v1341_v42  ;;  %v1473_v42 = vld [vmem:[#allocation10 + $0x1c0] sm:$0xff]  ;;  %v1474_v43 = vld [vmem:[#allocation10 + $0x1c8] sm:$0xff] }
 0x4e6   :  { %2329 = vmatpush3.bf16.msra.mxu0 %v2328_v46  ;;  %v1344_v46 = vld [vmem:[#allocation10 + $0x148] sm:$0xff] }
 0x4e7   :  { %2330 = vmatprep.subr.bf16.mxu0 %v2659_v51  ;;  %v2355_v47 = vpack.c.bf16 %v1344_v46, %v1343_v45  ;;  %v1475_v45 = vld [vmem:[#allocation10 + $0x1d0] sm:$0xff]  ;;  %v1476_v46 = vld [vmem:[#allocation10 + $0x1d8] sm:$0xff] }
 0x4ea   :  { %2332 = vmatpush3.bf16.msra.mxu0 %v2331_v49  ;;  %v1346_v49 = vld [vmem:[#allocation10 + $0x158] sm:$0xff] }
 0x4eb   :  { %2333 = vmatprep.subr.bf16.mxu0 %v2659_v51  ;;  %v2358_v50 = vpack.c.bf16 %v1346_v49, %v1345_v48  ;;  %v1477_v48 = vld [vmem:[#allocation10 + $0x1e0] sm:$0xff]  ;;  %v1478_v49 = vld [vmem:[#allocation10 + $0x1e8] sm:$0xff] }
 0x4ee   :  { %2335 = vmatpush3.bf16.msra.mxu0 %v2334_v53  ;;  %v1348_v53 = vld [vmem:[#allocation10 + $0x168] sm:$0xff] }
 0x4ef   :  { %2336 = vmatprep.subr.bf16.mxu0 %v2659_v51  ;;  %v2361_v54 = vpack.c.bf16 %v1348_v53, %v1347_v52  ;;  %v1479_v52 = vld [vmem:[#allocation10 + $0x1f0] sm:$0xff]  ;;  %v1480_v53 = vld [vmem:[#allocation10 + $0x1f8] sm:$0xff] }
 0x4f2   :  { %2338 = vmatpush3.bf16.msra.mxu0 %v2337_v56  ;;  %v1350_v56 = vld [vmem:[#allocation10 + $0x178] sm:$0xff] }
 0x4f3   :  { %2339 = vmatprep.subr.bf16.mxu0 %v2659_v51  ;;  %v2364_v57 = vpack.c.bf16 %v1350_v56, %v1349_v55  ;;  %v1739_v55 = vld [vmem:[#allocation11 + $0x2] ss:$0 sm:$0xff] }
 0x4f6   :  { %2341 = vmatpush3.bf16.msra.mxu0 %v2340_v59 }
 0x4f7   :  { %2366 = vmatprep.subr.bf16.mxu0 %v2659_v51 }
 0x5ac   :  { %v1070_v32 = vpop.f32.mrb[4].mxu0 }
 0x5ad   :  { %v1071_v33 = vadd.f32 %v1070_v32, %v1002_v31  ;;  %v1072_v34 = vpop.f32.mrb[5].mxu0 }
 0x5ae   :  { %v1335_v34 = vld [vmem:[#allocation10 + $0x100] sm:$0xff] }
 0x5af   :  { %2456 = vtanh.f32 %v1071_v33 }
 0x5b9   :  { %v2457_v35 = vpop.eup %2456 }
 0x5ba   :  { %1864 = vmatmul.mubr.f32.vlgmr.msra.gmra.mrb[4].mxu1 %v2457_v35  ;;  %v1336_v35 = vld [vmem:[#allocation10 + $0x108] sm:$0xff] }
 0x5bb   :  { %1933 = vmatprep.mubr.msk.f32.mxu1 %vm2660_vm1, %v2658_v0  ;;  %v2343_v36 = vpack.c.bf16 %v1336_v35, %v1335_v34  ;;  %v1467_v35 = vld [vmem:[#allocation10 + $0x190] sm:$0xff] }
 0x5bd   :  { %2344 = vmatpush3.bf16.msra.mxu1 %v2343_v36  ;;  %v1468_v36 = vld [vmem:[#allocation10 + $0x198] sm:$0xff] }
 0x5be   :  { %2345 = vmatprep.subr.bf16.mxu1 %v2659_v51  ;;  %v2370_v37 = vpack.c.bf16 %v1468_v36, %v1467_v35  ;;  %v1602_v35 = vld [vmem:[#allocation10 + $0x220] sm:$0xff]  ;;  %v1603_v36 = vld [vmem:[#allocation10 + $0x228] sm:$0xff] }
 0x5c1   :  { %2347 = vmatpush3.bf16.msra.mxu1 %v2346_v39  ;;  %v1470_v39 = vld [vmem:[#allocation10 + $0x1a8] sm:$0xff] }
 0x5c2   :  { %2348 = vmatprep.subr.bf16.mxu1 %v2659_v51  ;;  %v2373_v40 = vpack.c.bf16 %v1470_v39, %v1469_v38  ;;  %v1604_v38 = vld [vmem:[#allocation10 + $0x230] sm:$0xff]  ;;  %v1605_v39 = vld [vmem:[#allocation10 + $0x238] sm:$0xff] }
 0x5c5   :  { %2350 = vmatpush3.bf16.msra.mxu1 %v2349_v22 }
 0x5c6   :  { %2351 = vmatprep.subr.bf16.mxu1 %v2659_v51 }
 0x5c9   :  { %2353 = vmatpush3.bf16.msra.mxu1 %v2352_v44  ;;  %v2379_v44 = vpack.c.bf16 %v1474_v43, %v1473_v42  ;;  %v1608_v42 = vld [vmem:[#allocation10 + $0x250] sm:$0xff]  ;;  %v1609_v43 = vld [vmem:[#allocation10 + $0x258] sm:$0xff] }
 0x5ca   :  { %2354 = vmatprep.subr.bf16.mxu1 %v2659_v51 }
 0x5cd   :  { %2356 = vmatpush3.bf16.msra.mxu1 %v2355_v47  ;;  %v2382_v47 = vpack.c.bf16 %v1476_v46, %v1475_v45  ;;  %v1610_v45 = vld [vmem:[#allocation10 + $0x260] sm:$0xff]  ;;  %v1611_v46 = vld [vmem:[#allocation10 + $0x268] sm:$0xff] }
 0x5ce   :  { %2357 = vmatprep.subr.bf16.mxu1 %v2659_v51 }
 0x5d1   :  { %2359 = vmatpush3.bf16.msra.mxu1 %v2358_v50  ;;  %v2385_v50 = vpack.c.bf16 %v1478_v49, %v1477_v48  ;;  %v1612_v48 = vld [vmem:[#allocation10 + $0x270] sm:$0xff]  ;;  %v1613_v49 = vld [vmem:[#allocation10 + $0x278] sm:$0xff] }
 0x5d2   :  { %2360 = vmatprep.subr.bf16.mxu1 %v2659_v51 }
 0x5d5   :  { %2362 = vmatpush3.bf16.msra.mxu1 %v2361_v54  ;;  %v2388_v54 = vpack.c.bf16 %v1480_v53, %v1479_v52  ;;  %v1742_v52 = vld [vmem:[#allocation11 + $0x3] ss:$0 sm:$0xff] }
 0x5d6   :  { %2363 = vmatprep.subr.bf16.mxu1 %v2659_v51 }
 0x5d9   :  { %2365 = vmatpush3.bf16.msra.mxu1 %v2364_v57 }
 0x5da   :  { %2390 = vmatprep.subr.bf16.mxu1 %v2659_v51 }
 0x68d   :  { %v1162_v61 = vpop.f32.mrb[4].mxu1 }
 0x68e   :  { %v1163_v62 = vadd.f32 %v1733_v60, %v1162_v61  ;;  %v1865_v63 = vpop.f32.mrb[5].mxu1 }
 0x690   :  { %v1168_v1 = vmul.f32 %v2787_v27, %v1163_v62 }
 0x692   :  { %v1169_v2 = vrot.slane %v1168_v1, 4 }
 0x694   :  { %v1170_v3 = vadd.f32 %v1169_v2, %v1168_v1 }
 0x696   :  { %v1171_v4 = vrot.slane %v1170_v3, 2 }
 0x698   :  { %v1172_v5 = vadd.f32 %v1171_v4, %v1170_v3 }
 0x69a   :  { %v1173_v6 = vrot.slane %v1172_v5, 1 }
 0x69c   :  { %v1174_v7 = vadd.f32 %v1173_v6, %v1172_v5 }
 0x69e   :  { %v1175_v8 = vmul.f32 0.5, %v1174_v7 }
 0x6a0   :  { %v1176_v9 = vsub.f32 %v1163_v62, %v1175_v8 }
 0x6a2   :  { %v1177_v10 = vmul.f32 %v2787_v27, %v1176_v9 }
 0x6a4   :  { %v1178_v11 = vmul.f32 %v1177_v10, %v1177_v10 }
 0x6a6   :  { %v1179_v12 = vrot.slane %v1178_v11, 4 }
 0x6a8   :  { %v1180_v13 = vadd.f32 %v1179_v12, %v1178_v11 }
 0x6aa   :  { %v1181_v14 = vrot.slane %v1180_v13, 2 }
 0x6ac   :  { %v1182_v15 = vadd.f32 %v1181_v14, %v1180_v13 }
 0x6ae   :  { %v1183_v16 = vrot.slane %v1182_v15, 1 }
 0x6b0   :  { %v1184_v17 = vadd.f32 %v1183_v16, %v1182_v15 }
 0x6b2   :  { %v1185_v18 = vmul.f32 0.5, %v1184_v17 }
 0x6b4   :  { %v1186_v24 = vadd.f32 1e-05, %v1185_v18 }
 0x6b6   :  { %2458 = vrsqrt.f32 %v1186_v24  ;;  %v1737_v24 = vld [vmem:[#allocation11 + $0x9] ss:$0 sm:$0xff] }
 0x6c0   :  { %v2459_v19 = vpop.eup %2458 }
 0x6c1   :  { %v1188_v23 = vmul.f32 %v2459_v19, %v1176_v9 }
 0x6c3   :  { %v1193_v26 = vmul.f32 %v1734_v21, %v1188_v23  ;;  %v1738_v21 = vld [vmem:[#allocation11 + $0x11] ss:$0 sm:$0xff] }
 0x6c5   :  { %v1198_v28 = vadd.f32 %v1735_v25, %v1193_v26 }
 0x6c7   :  { %v1200_v29 = vmul.f32 0.70710677, %v1198_v28  ;;  %v1199_v31 = vmul.f32 0.5, %v1198_v28 }
 0x6c9   :  { %2460 = verf.f32 %v1200_v29 }
 0x6d3   :  { %v2461_v30 = vpop.eup %2460 }
 0x6d4   :  { %v1202_v32 = vadd.f32 1.0, %v2461_v30 }
 0x6d6   :  { %v1203_v33 = vmul.f32 %v1202_v32, %v1199_v31  ;;  %v1465_v32 = vld [vmem:[#allocation10 + $0x180] sm:$0xff] }
 0x6d8   :  { %1899 = vmatmul.mubr.f32.vlgmr.msra.gmra.mrb[6].mxu0 %v1203_v33  ;;  %v1466_v33 = vld [vmem:[#allocation10 + $0x188] sm:$0xff] }
 0x6d9   :  { %1968 = vmatprep.mubr.msk.f32.mxu0 %vm2660_vm1, %v2658_v0  ;;  %v2367_v34 = vpack.c.bf16 %v1466_v33, %v1465_v32  ;;  %v1600_v32 = vld [vmem:[#allocation10 + $0x210] sm:$0xff]  ;;  %v1601_v33 = vld [vmem:[#allocation10 + $0x218] sm:$0xff] }
 0x6db   :  { %2368 = vmatpush3.bf16.msra.mxu0 %v2367_v34  ;;  %v2394_v34 = vpack.c.bf16 %v1601_v33, %v1600_v32 }
 0x6dc   :  { %2369 = vmatprep.subr.bf16.mxu0 %v2659_v51 }
 0x6df   :  { %2371 = vmatpush3.bf16.msra.mxu0 %v2370_v37  ;;  %v2397_v37 = vpack.c.bf16 %v1603_v36, %v1602_v35 }
 0x6e0   :  { %2372 = vmatprep.subr.bf16.mxu0 %v2659_v51 }
 0x6e3   :  { %2374 = vmatpush3.bf16.msra.mxu0 %v2373_v40  ;;  %v2400_v40 = vpack.c.bf16 %v1605_v39, %v1604_v38 }
 0x6e4   :  { %2375 = vmatprep.subr.bf16.mxu0 %v2659_v51 }
 0x7ab   :  { %v1292_v59 = vpop.f32.mrb[6].mxu0 }
 0x7ac   :  { %v1293_v60 = vadd.f32 %v1736_v58, %v1292_v59  ;;  %v1900_v61 = vpop.f32.mrb[7].mxu0 }
 0x7ae   :  { %v1298_v62 = vmul.f32 %v2787_v27, %v1293_v60 }
 0x7b0   :  { %v1299_v63 = vrot.slane %v1298_v62, 4 }
 0x7b2   :  { %v1300_v1 = vadd.f32 %v1299_v63, %v1298_v62 }
 0x7b4   :  { %v1301_v2 = vrot.slane %v1300_v1, 2 }
 0x7b6   :  { %v1302_v3 = vadd.f32 %v1301_v2, %v1300_v1 }
 0x7b8   :  { %v1303_v4 = vrot.slane %v1302_v3, 1 }
 0x7ba   :  { %v1304_v5 = vadd.f32 %v1303_v4, %v1302_v3 }
 0x7bc   :  { %v1305_v6 = vmul.f32 0.5, %v1304_v5 }
 0x7be   :  { %v1306_v7 = vsub.f32 %v1293_v60, %v1305_v6 }
 0x7c0   :  { %v1307_v8 = vmul.f32 %v2787_v27, %v1306_v7 }
 0x7c2   :  { %v1308_v9 = vmul.f32 %v1307_v8, %v1307_v8 }
 0x7c4   :  { %v1309_v10 = vrot.slane %v1308_v9, 4 }
 0x7c6   :  { %v1310_v11 = vadd.f32 %v1309_v10, %v1308_v9 }
 0x7c8   :  { %v1311_v12 = vrot.slane %v1310_v11, 2 }
 0x7ca   :  { %v1312_v13 = vadd.f32 %v1311_v12, %v1310_v11 }
 0x7cc   :  { %v1313_v14 = vrot.slane %v1312_v13, 1 }
 0x7ce   :  { %v1314_v15 = vadd.f32 %v1313_v14, %v1312_v13 }
 0x7d0   :  { %v1315_v16 = vmul.f32 0.5, %v1314_v15 }
 0x7d2   :  { %v1316_v17 = vadd.f32 1e-05, %v1315_v16  ;;  %v1740_v16 = vld [vmem:[#allocation11 + $0xa] ss:$0 sm:$0xff] }
 0x7d4   :  { %2462 = vrsqrt.f32 %v1316_v17 }
 0x7de   :  { %v2463_v18 = vpop.eup %2462 }
 0x7df   :  { %v1318_v19 = vmul.f32 %v2463_v18, %v1306_v7  ;;  %v1741_v18 = vld [vmem:[#allocation11 + $0x12] ss:$0 sm:$0xff] }
 0x7e1   :  { %v1323_v23 = vmul.f32 %v1737_v24, %v1318_v19 }
 0x7e3   :  { %v1328_v25 = vadd.f32 %v1738_v21, %v1323_v23 }
 0x7e5   :  { %v1330_v26 = vmul.f32 0.70710677, %v1328_v25  ;;  %v1329_v29 = vmul.f32 0.5, %v1328_v25 }
 0x7e7   :  { %2464 = verf.f32 %v1330_v26 }
 0x7f1   :  { %v2465_v28 = vpop.eup %2464 }
 0x7f2   :  { %v1332_v30 = vadd.f32 1.0, %v2465_v28 }
 0x7f4   :  { %v1333_v31 = vmul.f32 %v1332_v30, %v1329_v29  ;;  %v1598_v29 = vld [vmem:[#allocation10 + $0x200] sm:$0xff]  ;;  %v1599_v30 = vld [vmem:[#allocation10 + $0x208] sm:$0xff] }
 0x7f6   :  { %1934 = vmatmul.mubr.f32.vlgmr.msra.gmra.mrb[6].mxu1 %v1333_v31  ;;  %v2391_v31 = vpack.c.bf16 %v1599_v30, %v1598_v29 }
 0x7f7   :  { %2003 = vmatprep.mubr.msk.f32.mxu1 %vm2660_vm1, %v2658_v0  ;;  %v1472_v0 = vld [vmem:[#allocation10 + $0x1b8] sm:$0xff] }
 0x7f8   :  { %v2376_v22 = vpack.c.bf16 %v1472_v0, %v1471_v41  ;;  %2392 = vmatpush3.bf16.msra.mxu1 %v2391_v31  ;;  %v1606_v41 = vld [vmem:[#allocation10 + $0x240] sm:$0xff]  ;;  %v1607_v0 = vld [vmem:[#allocation10 + $0x248] sm:$0xff] }
 0x7f9   :  { %2393 = vmatprep.subr.bf16.mxu1 %v2659_v51 }
 0x7fa   :  { %2377 = vmatpush3.bf16.msra.mxu0 %v2376_v22  ;;  %v2403_v22 = vpack.c.bf16 %v1607_v0, %v1606_v41 }
 0x7fb   :  { %2378 = vmatprep.subr.bf16.mxu0 %v2659_v51 }
 0x7fc   :  { %2395 = vmatpush3.bf16.msra.mxu1 %v2394_v34 }
 0x7fd   :  { %2396 = vmatprep.subr.bf16.mxu1 %v2659_v51 }
 0x7fe   :  { %2380 = vmatpush3.bf16.msra.mxu0 %v2379_v44  ;;  %v2406_v44 = vpack.c.bf16 %v1609_v43, %v1608_v42 }
 0x7ff   :  { %2381 = vmatprep.subr.bf16.mxu0 %v2659_v51 }
 0x800   :  { %2398 = vmatpush3.bf16.msra.mxu1 %v2397_v37 }
 0x801   :  { %2399 = vmatprep.subr.bf16.mxu1 %v2659_v51 }
 0x802   :  { %2383 = vmatpush3.bf16.msra.mxu0 %v2382_v47  ;;  %v2409_v47 = vpack.c.bf16 %v1611_v46, %v1610_v45 }
 0x803   :  { %2384 = vmatprep.subr.bf16.mxu0 %v2659_v51 }
 0x804   :  { %2401 = vmatpush3.bf16.msra.mxu1 %v2400_v40 }
 0x805   :  { %2402 = vmatprep.subr.bf16.mxu1 %v2659_v51 }
 0x806   :  { %2386 = vmatpush3.bf16.msra.mxu0 %v2385_v50  ;;  %v2412_v50 = vpack.c.bf16 %v1613_v49, %v1612_v48 }
 0x807   :  { %2387 = vmatprep.subr.bf16.mxu0 %v2659_v51 }
 0x808   :  { %2404 = vmatpush3.bf16.msra.mxu1 %v2403_v22 }
 0x809   :  { %2405 = vmatprep.subr.bf16.mxu1 %v2659_v51 }
 0x80a   :  { %2389 = vmatpush3.bf16.msra.mxu0 %v2388_v54 }
 0x80c   :  { %2407 = vmatpush3.bf16.msra.mxu1 %v2406_v44 }
 0x80d   :  { %2408 = vmatprep.subr.bf16.mxu1 %v2659_v51 }
 0x810   :  { %2410 = vmatpush3.bf16.msra.mxu1 %v2409_v47 }
 0x811   :  { %2411 = vmatprep.subr.bf16.mxu1 %v2659_v51 }
 0x814   :  { %2413 = vmatpush3.bf16.msra.mxu1 %v2412_v50 }
 0x8c9   :  { %v1422_v56 = vpop.f32.mrb[6].mxu1 }
 0x8ca   :  { %v1423_v57 = vadd.f32 %v1739_v55, %v1422_v56  ;;  %v1935_v58 = vpop.f32.mrb[7].mxu1 }
 0x8cc   :  { %v1428_v59 = vmul.f32 %v2787_v27, %v1423_v57 }
 0x8ce   :  { %v1429_v60 = vrot.slane %v1428_v59, 4 }
 0x8d0   :  { %v1430_v61 = vadd.f32 %v1429_v60, %v1428_v59 }
 0x8d2   :  { %v1431_v62 = vrot.slane %v1430_v61, 2 }
 0x8d4   :  { %v1432_v63 = vadd.f32 %v1431_v62, %v1430_v61 }
 0x8d6   :  { %v1433_v1 = vrot.slane %v1432_v63, 1 }
 0x8d8   :  { %v1434_v2 = vadd.f32 %v1433_v1, %v1432_v63 }
 0x8da   :  { %v1435_v3 = vmul.f32 0.5, %v1434_v2 }
 0x8dc   :  { %v1436_v4 = vsub.f32 %v1423_v57, %v1435_v3 }
 0x8de   :  { %v1437_v5 = vmul.f32 %v2787_v27, %v1436_v4 }
 0x8e0   :  { %v1438_v6 = vmul.f32 %v1437_v5, %v1437_v5 }
 0x8e2   :  { %v1439_v7 = vrot.slane %v1438_v6, 4 }
 0x8e4   :  { %v1440_v8 = vadd.f32 %v1439_v7, %v1438_v6 }
 0x8e6   :  { %v1441_v9 = vrot.slane %v1440_v8, 2 }
 0x8e8   :  { %v1442_v10 = vadd.f32 %v1441_v9, %v1440_v8 }
 0x8ea   :  { %v1443_v11 = vrot.slane %v1442_v10, 1 }
 0x8ec   :  { %v1444_v12 = vadd.f32 %v1443_v11, %v1442_v10 }
 0x8ee   :  { %v1445_v13 = vmul.f32 0.5, %v1444_v12  ;;  %v111_v12 = vand.u32 127, %v105_v20 }
 0x8f0   :  { %v1446_v14 = vadd.f32 1e-05, %v1445_v13  ;;  %v1743_v13 = vld [vmem:[#allocation11 + $0xb] ss:$0 sm:$0xff]  ;;  %vm113_vm2 = vcmp.lt.s32.totalorder %v111_v12, 64  ;;  %vm112_vm3 = vcmp.lt.s32.totalorder %v111_v12, 8 }
 0x8f2   :  { %2466 = vrsqrt.f32 %v1446_v14 }
 0x8fc   :  { %v2467_v15 = vpop.eup %2466 }
 0x8fd   :  { %v1448_v17 = vmul.f32 %v2467_v15, %v1436_v4  ;;  %v1744_v15 = vld [vmem:[#allocation11 + $0x13] ss:$0 sm:$0xff] }
 0x8ff   :  { %v1453_v24 = vmul.f32 %v1740_v16, %v1448_v17 }
 0x901   :  { %v1458_v19 = vadd.f32 %v1741_v18, %v1453_v24 }
 0x903   :  { %v1460_v21 = vmul.f32 0.70710677, %v1458_v19  ;;  %v1459_v25 = vmul.f32 0.5, %v1458_v19 }
 0x905   :  { %2468 = verf.f32 %v1460_v21 }
 0x90f   :  { %v2469_v23 = vpop.eup %2468 }
 0x910   :  { %v1462_v26 = vadd.f32 1.0, %v2469_v23 }
 0x912   :  { %v1463_v28 = vmul.f32 %v1462_v26, %v1459_v25 }
 0x914   :  { %1969 = vmatmul.mubr.f32.vlgmr.msra.gmra.mrb[8].mxu0 %v1463_v28  ;;  %v1745_v28 = vld [vmem:[#allocation11 + $0x4] ss:$0 sm:$0xff] }
 0x9e7   :  { %v1552_v53 = vpop.f32.mrb[8].mxu0 }
 0x9e8   :  { %v1553_v54 = vadd.f32 %v1742_v52, %v1552_v53  ;;  %v1970_v55 = vpop.f32.mrb[9].mxu0 }
 0x9ea   :  { %v1558_v56 = vmul.f32 %v2787_v27, %v1553_v54 }
 0x9ec   :  { %v1559_v57 = vrot.slane %v1558_v56, 4 }
 0x9ee   :  { %v1560_v58 = vadd.f32 %v1559_v57, %v1558_v56 }
 0x9f0   :  { %v1561_v59 = vrot.slane %v1560_v58, 2 }
 0x9f2   :  { %v1562_v60 = vadd.f32 %v1561_v59, %v1560_v58 }
 0x9f4   :  { %v1563_v61 = vrot.slane %v1562_v60, 1 }
 0x9f6   :  { %v1564_v62 = vadd.f32 %v1563_v61, %v1562_v60 }
 0x9f8   :  { %v1565_v63 = vmul.f32 0.5, %v1564_v62 }
 0x9fa   :  { %v1566_v1 = vsub.f32 %v1553_v54, %v1565_v63 }
 0x9fc   :  { %v1567_v2 = vmul.f32 %v2787_v27, %v1566_v1 }
 0x9fe   :  { %v1568_v3 = vmul.f32 %v1567_v2, %v1567_v2 }
 0xa00   :  { %v1569_v4 = vrot.slane %v1568_v3, 4 }
 0xa02   :  { %v1570_v51 = vadd.f32 %v1569_v4, %v1568_v3 }
 0xa04   :  { %v1571_v5 = vrot.slane %v1570_v51, 2 }
 0xa06   :  { %v1572_v6 = vadd.f32 %v1571_v5, %v1570_v51 }
 0xa08   :  { %v1573_v7 = vrot.slane %v1572_v6, 1 }
 0xa0a   :  { %v1574_v8 = vadd.f32 %v1573_v7, %v1572_v6 }
 0xa0c   :  { %v1575_v9 = vmul.f32 0.5, %v1574_v8 }
 0xa0e   :  { %v1576_v10 = vadd.f32 1e-05, %v1575_v9 }
 0xa10   :  { %2470 = vrsqrt.f32 %v1576_v10 }
 0xa1a   :  { %v2471_v11 = vpop.eup %2470 }
 0xa1b   :  { %v1578_v14 = vmul.f32 %v2471_v11, %v1566_v1 }
 0xa1d   :  { %v1583_v16 = vmul.f32 %v1743_v13, %v1578_v14 }
 0xa1f   :  { %v1588_v17 = vadd.f32 %v1744_v15, %v1583_v16 }
 0xa21   :  { %v1589_v27 = vsel %vm113_vm2, %v1588_v17, %v1553_v54 }
 0xa22   :  { %v1591_v18 = vmul.f32 0.70710677, %v1589_v27  ;;  %v1590_v19 = vmul.f32 0.5, %v1589_v27 }
 0xa24   :  { %2472 = verf.f32 %v1591_v18 }
 0xa25   :  { %2474 = vtanh.f32 %v1589_v27 }
 0xa2e   :  { %v2473_v24 = vpop.eup %2472 }
 0xa2f   :  { %v1593_v21 = vadd.f32 1.0, %v2473_v24  ;;  %v2475_v25 = vpop.eup %2474 }
 0xa31   :  { %v1594_v23 = vmul.f32 %v1593_v21, %v1590_v19 }
 0xa33   :  { %v1596_v26 = vsel %vm113_vm2, %v1594_v23, %v2475_v25 }
 0xa34   :  { %2004 = vmatmul.mubr.f32.vlgmr.msra.gmra.mrb[8].mxu1 %v1596_v26 }
 0xb07   :  { %v1685_v29 = vpop.f32.mrb[8].mxu1 }
 0xb08   :  { %v1686_v20 = vadd.f32 %v1745_v28, %v1685_v29  ;;  %v2005_v30 = vpop.f32.mrb[9].mxu1 }
 0xb0a   :  { %1713 = vst [vmem:[#allocation13 + $0x10] sm:$0xff] %v1686_v20  ;;  %v1689_v31 = vsel %vm112_vm3, %v1686_v20, -1e+30 }
 0xb0b   :  { %1690 = vmax.xlane.f32.xlu0 %v1689_v31 }
 0xb98   :  { %v1691_v32 = vpop.xlane.xlu0 %1690 }
 0xb99   :  { %v1692_v33 = vsub.f32 %v1689_v31, %v1691_v32 }
 0xb9b   :  { %v1693_v34 = vmul.f32 1.442695, %v1692_v33 }
 0xb9d   :  { %2476 = vpow2.f32 %v1693_v34 }
 0xba7   :  { %v2477_v35 = vpop.eup %2476 }
 0xba8   :  { %v1695_v36 = vsel %vm112_vm3, %v2477_v35, 0.0 }
 0xba9   :  { %1696 = vadd.xlane.f32.xlu0 %v1695_v36 }
 0xc36   :  { %v1697_v37 = vpop.xlane.xlu0 %1696 }
 0xc37   :  { %2478 = vrcp.f32 %v1697_v37 }
 0xc41   :  { %v2479_v38 = vpop.eup %2478 }
 0xc42   :  { %v1699_v39 = vmul.f32 %v2479_v38, %v1695_v36 }
 0xc44   :  { %v1700_v40 = vsel %vm112_vm3, %v1699_v39, -1e+30  ;;  %1711 = vst [vmem:[#allocation13] sm:$0xff] %v1699_v39 }
 0xc45   :  { %1701 = vmax.xlane.f32.xlu1 %v1700_v40 }
 0xcd2   :  { %v1702_v41 = vpop.xlane.xlu1 %1701 }
 0xcd3   :  { %v1703_v0 = vsub.f32 %v1700_v40, %v1702_v41 }
 0xcd5   :  { %v1704_v22 = vmul.f32 1.442695, %v1703_v0 }
 0xcd7   :  { %2480 = vpow2.f32 %v1704_v22 }
 0xce1   :  { %v2481_v42 = vpop.eup %2480 }
 0xce2   :  { %v1706_v43 = vsel %vm112_vm3, %v2481_v42, 0.0 }
 0xce3   :  { %1707 = vadd.xlane.f32.xlu1 %v1706_v43 }
 0xd70   :  { %v1708_v44 = vpop.xlane.xlu1 %1707 }
 0xd71   :  { %2482 = vrcp.f32 %v1708_v44 }
 0xd7b   :  { %v2483_v45 = vpop.eup %2482 }
 0xd7c   :  { %v1710_v46 = vmul.f32 %v2483_v45, %v1706_v43 }
 0xd7e   :  { %1712 = vst [vmem:[#allocation13 + $0x8] sm:$0xff] %v1710_v46 }
 0xd7f   :  { %2627 = shalt.err (!%p2624_p10)
}
 0xd80   :  { %s2628_s22 = scalar_lea.hbm %s2901_s6, 384 }
 0xd81   :  { %p2629_p11 = scmp.ne.s32.totalorder %s2901_s6, %s2628_s22  ;;  %p2632_p12 = scmp.lt.u32.totalorder %s2628_s22, %s2901_s6 }
 0xd83   :  { %p2634_p13 = pnand %p2632_p12, %p2629_p11 }
 0xd85   :  { %2637 = shalt.err (!%p2634_p13)
}
 0xd86   :  { %1723 = dma.vmem_to_hbm [thread:$0]  %s1721_s21, 384, %s2901_s6, [#allocation4]  }
 0xd87   :  { %2646 = dma.done.wait [#allocation4], 384  }
 0xd88   :  { %2647 = vsyncadd [#allocation4], 4294966912 }
 0xd89   :  { %1727 = vsyncpa [#allocation3], 1 }
 0xd8a   :  { %1728 = vsyncpa [#allocation6], 1 }
 0xd8b   :  { %1729 = vsyncpa [#allocation9], 1 }
 0xd8c   :  { %1730 = vsyncpa [#allocation12], 1 }
 0xd8d   :  { %1731 = vsyncpa [#allocation4], 1 }

</bundles_post_ra>
